<compile_context>
chip_gen: v7x
topology: tpu7x:2x2x1
jax: 0.10.0
libtpu: 0.0.40
codegen_flags: <defaults>
</compile_context>

<pallas_src>
import jax
import jax.numpy as jnp
from jax.experimental import pallas as pl
from jax.experimental.pallas import tpu as pltpu


def encoder_decoder_kernel(x_ref, wxe_ref, whe_ref, be_ref,
                           wihd_ref, whhd_ref, bd_ref, wfc_ref, bfc_ref,
                           out_ref,
                           xproj_scr):
    """Single-invocation kernel: encoder LSTM + autoregressive decoder + fc.

    x_ref:     (T_in*B, I)    time-major, flattened over (time, batch), B padded to 8k
    wxe_ref:   (I, 4H)        encoder W_ih^T
    whe_ref:   (H, 4H)        encoder W_hh^T
    be_ref:    (1, 4H)        encoder b_ih + b_hh
    wihd_ref:  (O, 4H)        decoder W_ih^T
    whhd_ref:  (H, 4H)        decoder W_hh^T
    bd_ref:    (1, 4H)        decoder b_ih + b_hh
    wfc_ref:   (H, O)         fc W^T
    bfc_ref:   (1, O)         fc bias
    out_ref:   (T_out, B, O)  time-major decoder outputs (VMEM-resident block)
    xproj_scr: (T_in, B, 4H)  hoisted encoder input projections (tile-aligned per step)
    """
    T_out, B, O = out_ref.shape
    T_in = xproj_scr.shape[0]
    H = wfc_ref.shape[0]
    TB = T_in * B

    # ---- hoisted weight loads & bias broadcasts (outside both loops) ----
    w_hh_e = whe_ref[...]                                     # (H, 4H)
    w_ih_d = wihd_ref[...]                                    # (O, 4H)
    w_hh_d = whhd_ref[...]                                    # (H, 4H)
    w_fc = wfc_ref[...]                                       # (H, O)
    b_dec = jnp.broadcast_to(bd_ref[...], (B, 4 * H))
    b_fc = jnp.broadcast_to(bfc_ref[...], (B, O))

    # ---- Encoder input projection: ONE MXU-shaped matmul for all steps ----
    proj = (jnp.dot(x_ref[...], wxe_ref[...],
                    preferred_element_type=jnp.float32)
            + jnp.broadcast_to(be_ref[...], (TB, 4 * H)))
    xproj_scr[...] = proj.reshape(T_in, B, 4 * H)

    def lstm_cell(gates, c_prev):
        # PyTorch gate order: i, f, g, o
        i = jax.nn.sigmoid(gates[:, 0 * H:1 * H])
        f = jax.nn.sigmoid(gates[:, 1 * H:2 * H])
        g = jnp.tanh(gates[:, 2 * H:3 * H])
        o = jax.nn.sigmoid(gates[:, 3 * H:4 * H])
        c_new = f * c_prev + i * g
        h_new = o * jnp.tanh(c_new)
        return h_new, c_new

    # ---- Encoder recurrence: one small matmul per step, aligned loads ----
    def enc_body(t, carry):
        h, c = carry
        gates = (xproj_scr[t]
                 + jnp.dot(h, w_hh_e, preferred_element_type=jnp.float32))
        return lstm_cell(gates, c)

    h0 = jnp.zeros((B, H), jnp.float32)
    c0 = jnp.zeros((B, H), jnp.float32)
    h, c = jax.lax.fori_loop(0, T_in, enc_body, (h0, c0), unroll=True)

    # ---- Autoregressive decoder: y/h/c stay in vregs (no VMEM round-trip) ----
    def dec_body(t, carry):
        y_prev, h_prev, c_prev = carry
        gates = (jnp.dot(y_prev, w_ih_d, preferred_element_type=jnp.float32)
                 + jnp.dot(h_prev, w_hh_d, preferred_element_type=jnp.float32)
                 + b_dec)
        h_new, c_new = lstm_cell(gates, c_prev)
        y = jnp.dot(h_new, w_fc, preferred_element_type=jnp.float32) + b_fc
        out_ref[t] = y.astype(out_ref.dtype)     # VMEM-resident output block
        return y, h_new, c_new

    y0 = jnp.zeros((B, O), jnp.float32)          # decoder_input_0 = zeros
    jax.lax.fori_loop(0, T_out, dec_body, (y0, h, c), unroll=True)


def encoder_decoder_forward(x, params, output_seq_len):
    """x: (B, T_in, input_size) batch_first. Returns (B, output_seq_len, output_size)."""
    B, T_in, I = x.shape
    H = params["enc_w_hh"].shape[1]
    O = params["w_fc"].shape[0]
    T_out = output_seq_len

    # Pad batch to a multiple of 8 (sublane count) so all vregs are unmasked.
    B_pad = max(8, ((B + 7) // 8) * 8)
    if B_pad != B:
        x = jnp.pad(x, ((0, B_pad - B), (0, 0), (0, 0)))

    # Time-major, flattened (time, batch) rows so the input projection is one matmul.
    x_flat = jnp.transpose(x, (1, 0, 2)).reshape(T_in * B_pad, I)

    wxe = params["enc_w_ih"].T                                     # (I, 4H)
    whe = params["enc_w_hh"].T                                     # (H, 4H)
    be = (params["enc_b_ih"] + params["enc_b_hh"]).reshape(1, 4 * H)
    wihd = params["dec_w_ih"].T                                    # (O, 4H)
    whhd = params["dec_w_hh"].T                                    # (H, 4H)
    bd = (params["dec_b_ih"] + params["dec_b_hh"]).reshape(1, 4 * H)
    wfc = params["w_fc"].T                                         # (H, O)
    bfc = params["b_fc"].reshape(1, O)

    out_tm = pl.pallas_call(
        encoder_decoder_kernel,
        out_shape=jax.ShapeDtypeStruct((T_out, B_pad, O), x.dtype),
        grid_spec=pltpu.PrefetchScalarGridSpec(
            num_scalar_prefetch=0,
            grid=(1,),
            in_specs=[
                pl.BlockSpec((T_in * B_pad, I), lambda i: (0, 0)),  # x (flattened)
                pl.BlockSpec((I, 4 * H), lambda i: (0, 0)),         # enc W_ih^T
                pl.BlockSpec((H, 4 * H), lambda i: (0, 0)),         # enc W_hh^T
                pl.BlockSpec((1, 4 * H), lambda i: (0, 0)),         # enc bias
                pl.BlockSpec((O, 4 * H), lambda i: (0, 0)),         # dec W_ih^T
                pl.BlockSpec((H, 4 * H), lambda i: (0, 0)),         # dec W_hh^T
                pl.BlockSpec((1, 4 * H), lambda i: (0, 0)),         # dec bias
                pl.BlockSpec((H, O), lambda i: (0, 0)),             # fc W^T
                pl.BlockSpec((1, O), lambda i: (0, 0)),             # fc bias
            ],
            out_specs=pl.BlockSpec((T_out, B_pad, O), lambda i: (0, 0, 0)),
            scratch_shapes=[
                pltpu.VMEM((T_in, B_pad, 4 * H), jnp.float32),      # hoisted x-proj
            ],
        ),
        compiler_params=pltpu.CompilerParams(
            dimension_semantics=("arbitrary",)),
    )(x_flat, wxe, whe, be, wihd, whhd, bd, wfc, bfc)

    out = jnp.transpose(out_tm, (1, 0, 2))                          # batch_first
    return out[:B]                                                  # drop batch padding


def init_params(key, input_size, hidden_size, output_size):
    """Deterministic init with PyTorch shapes (uniform +-1/sqrt(H))."""
    k = 1.0 / jnp.sqrt(jnp.float32(hidden_size))
    keys = jax.random.split(key, 10)
    u = lambda kk, shape: jax.random.uniform(kk, shape, jnp.float32, -k, k)
    H, I, O = hidden_size, input_size, output_size
    return {
        "enc_w_ih": u(keys[0], (4 * H, I)),
        "enc_w_hh": u(keys[1], (4 * H, H)),
        "enc_b_ih": u(keys[2], (4 * H,)),
        "enc_b_hh": u(keys[3], (4 * H,)),
        "dec_w_ih": u(keys[4], (4 * H, O)),
        "dec_w_hh": u(keys[5], (4 * H, H)),
        "dec_b_ih": u(keys[6], (4 * H,)),
        "dec_b_hh": u(keys[7], (4 * H,)),
        "w_fc":     u(keys[8], (O, H)),
        "b_fc":     u(keys[9], (O,)),
    }


def encoder_decoder_reference(x, p, output_seq_len):
    """Pure-JAX reference, semantically identical to EncoderDecoder.forward."""
    B, T_in, _ = x.shape
    H = p["enc_w_hh"].shape[1]
    O = p["w_fc"].shape[0]

    def lstm_step(x_t, h, c, w_ih, w_hh, b_ih, b_hh):
        g = x_t @ w_ih.T + b_ih + h @ w_hh.T + b_hh
        i = jax.nn.sigmoid(g[:, :H])
        f = jax.nn.sigmoid(g[:, H:2 * H])
        gg = jnp.tanh(g[:, 2 * H:3 * H])
        o = jax.nn.sigmoid(g[:, 3 * H:])
        c = f * c + i * gg
        h = o * jnp.tanh(c)
        return h, c

    h = jnp.zeros((B, H), jnp.float32)
    c = jnp.zeros((B, H), jnp.float32)
    for t in range(T_in):                                   # encoder
        h, c = lstm_step(x[:, t], h, c, p["enc_w_ih"], p["enc_w_hh"],
                         p["enc_b_ih"], p["enc_b_hh"])
    y = jnp.zeros((B, O), jnp.float32)                      # decoder_input = 0
    outs = []
    for t in range(output_seq_len):                         # autoregressive decoder
        h, c = lstm_step(y, h, c, p["dec_w_ih"], p["dec_w_hh"],
                         p["dec_b_ih"], p["dec_b_hh"])
        y = h @ p["w_fc"].T + p["b_fc"]
        outs.append(y)
    return jnp.stack(outs, axis=1)


if __name__ == "__main__":
    B, INPUT_SEQ_LEN, OUTPUT_SEQ_LEN = 2, 8, 5
    INPUT_SIZE, HIDDEN, OUTPUT_SIZE = 16, 32, 8

    key = jax.random.PRNGKey(0)
    kx, kp = jax.random.split(key)
    x = jax.random.normal(kx, (B, INPUT_SEQ_LEN, INPUT_SIZE), jnp.float32)
    params = init_params(kp, INPUT_SIZE, HIDDEN, OUTPUT_SIZE)

    out = encoder_decoder_forward(x, params, OUTPUT_SEQ_LEN)
    jax.block_until_ready(out)

    out_ref = encoder_decoder_reference(x, params, OUTPUT_SEQ_LEN)
    assert out.shape == (B, OUTPUT_SEQ_LEN, OUTPUT_SIZE)
    max_err = jnp.max(jnp.abs(out - out_ref))
    assert jnp.allclose(out, out_ref, atol=1e-3, rtol=1e-3), f"max abs err={max_err}"

    print("KERNEL_OK")
</pallas_src>

<mosaic_0001>
module attributes {stable_mosaic.version = 11 : i64} {
  func.func @encoder_decoder_kernel(%arg0: i32, %arg1: memref<64x16xf32, #tpu.memory_space<vmem>>, %arg2: memref<16x128xf32, #tpu.memory_space<vmem>>, %arg3: memref<32x128xf32, #tpu.memory_space<vmem>>, %arg4: memref<1x128xf32, #tpu.memory_space<vmem>>, %arg5: memref<8x128xf32, #tpu.memory_space<vmem>>, %arg6: memref<32x128xf32, #tpu.memory_space<vmem>>, %arg7: memref<1x128xf32, #tpu.memory_space<vmem>>, %arg8: memref<32x8xf32, #tpu.memory_space<vmem>>, %arg9: memref<1x8xf32, #tpu.memory_space<vmem>>, %arg10: memref<5x8x8xf32, #tpu.memory_space<vmem>>, %arg11: memref<8x8x128xf32, #tpu.memory_space<vmem>>) attributes {dimension_semantics = [#tpu.dimension_semantics<arbitrary>], iteration_bounds = array<i64: 1>, scalar_prefetch = 0 : i64, scratch_operands = 1 : i64, tpu.core_type = #tpu.core_type<tc>, window_params = [{pipeline_mode = #tpu.pipeline_mode<synchronous>, transform_indices = @transform_0, window_bounds = array<i64: 64, 16>}, {pipeline_mode = #tpu.pipeline_mode<synchronous>, transform_indices = @transform_1, window_bounds = array<i64: 16, 128>}, {pipeline_mode = #tpu.pipeline_mode<synchronous>, transform_indices = @transform_2, window_bounds = array<i64: 32, 128>}, {pipeline_mode = #tpu.pipeline_mode<synchronous>, transform_indices = @transform_3, window_bounds = array<i64: 1, 128>}, {pipeline_mode = #tpu.pipeline_mode<synchronous>, transform_indices = @transform_4, window_bounds = array<i64: 8, 128>}, {pipeline_mode = #tpu.pipeline_mode<synchronous>, transform_indices = @transform_5, window_bounds = array<i64: 32, 128>}, {pipeline_mode = #tpu.pipeline_mode<synchronous>, transform_indices = @transform_6, window_bounds = array<i64: 1, 128>}, {pipeline_mode = #tpu.pipeline_mode<synchronous>, transform_indices = @transform_7, window_bounds = array<i64: 32, 8>}, {pipeline_mode = #tpu.pipeline_mode<synchronous>, transform_indices = @transform_8, window_bounds = array<i64: 1, 8>}, {pipeline_mode = #tpu.pipeline_mode<synchronous>, transform_indices = @transform_9, window_bounds = array<i64: 5, 8, 8>}]} {
    %c0 = arith.constant 0 : index
    %c0_0 = arith.constant 0 : index
    %0 = vector.load %arg3[%c0, %c0_0] : memref<32x128xf32, #tpu.memory_space<vmem>>, vector<32x128xf32>
    %c0_1 = arith.constant 0 : index
    %c0_2 = arith.constant 0 : index
    %1 = vector.load %arg5[%c0_1, %c0_2] : memref<8x128xf32, #tpu.memory_space<vmem>>, vector<8x128xf32>
    %c0_3 = arith.constant 0 : index
    %c0_4 = arith.constant 0 : index
    %2 = vector.load %arg6[%c0_3, %c0_4] : memref<32x128xf32, #tpu.memory_space<vmem>>, vector<32x128xf32>
    %c0_5 = arith.constant 0 : index
    %c0_6 = arith.constant 0 : index
    %3 = vector.load %arg8[%c0_5, %c0_6] : memref<32x8xf32, #tpu.memory_space<vmem>>, vector<32x8xf32>
    %c0_7 = arith.constant 0 : index
    %c0_8 = arith.constant 0 : index
    %4 = vector.load %arg7[%c0_7, %c0_8] : memref<1x128xf32, #tpu.memory_space<vmem>>, vector<1x128xf32>
    %5 = vector.shape_cast %4 : vector<1x128xf32> to vector<1x128xf32>
    %6 = vector.broadcast %5 : vector<1x128xf32> to vector<8x128xf32>
    %c0_9 = arith.constant 0 : index
    %c0_10 = arith.constant 0 : index
    %7 = vector.load %arg9[%c0_9, %c0_10] : memref<1x8xf32, #tpu.memory_space<vmem>>, vector<1x8xf32>
    %8 = vector.shape_cast %7 : vector<1x8xf32> to vector<1x8xf32>
    %9 = vector.broadcast %8 : vector<1x8xf32> to vector<8x8xf32>
    %c0_11 = arith.constant 0 : index
    %c0_12 = arith.constant 0 : index
    %10 = vector.load %arg1[%c0_11, %c0_12] : memref<64x16xf32, #tpu.memory_space<vmem>>, vector<64x16xf32>
    %c0_13 = arith.constant 0 : index
    %c0_14 = arith.constant 0 : index
    %11 = vector.load %arg2[%c0_13, %c0_14] : memref<16x128xf32, #tpu.memory_space<vmem>>, vector<16x128xf32>
    %cst = arith.constant dense<0.000000e+00> : vector<64x128xf32>
    %12 = tpu.matmul %10, %11, %cst {dimension_numbers = #tpu.dot_dimension_numbers<[1], [0], [0], [1], [0, 0, 1, 1], [], []>} : vector<64x16xf32>, vector<16x128xf32>, vector<64x128xf32> -> vector<64x128xf32>
    %c0_15 = arith.constant 0 : index
    %c0_16 = arith.constant 0 : index
    %13 = vector.load %arg4[%c0_15, %c0_16] : memref<1x128xf32, #tpu.memory_space<vmem>>, vector<1x128xf32>
    %14 = vector.shape_cast %13 : vector<1x128xf32> to vector<1x128xf32>
    %15 = vector.broadcast %14 : vector<1x128xf32> to vector<64x128xf32>
    %16 = arith.addf %12, %15 : vector<64x128xf32>
    %17 = vector.shape_cast %16 : vector<64x128xf32> to vector<8x8x128xf32>
    %c0_17 = arith.constant 0 : index
    %c0_18 = arith.constant 0 : index
    %c0_19 = arith.constant 0 : index
    %18 = vector.load %arg11[%c0_17, %c0_18, %c0_19] : memref<8x8x128xf32, #tpu.memory_space<vmem>>, vector<8x8x128xf32>
    tpu.vector_store %arg11[%c0_17, %c0_18, %c0_19], %17 {strides = array<i32>} : memref<8x8x128xf32, #tpu.memory_space<vmem>>, vector<8x8x128xf32>,
    %cst_20 = arith.constant 0.000000e+00 : f32
    %19 = vector.broadcast %cst_20 : f32 to vector<8x32xf32>
    %cst_21 = arith.constant 0.000000e+00 : f32
    %20 = vector.broadcast %cst_21 : f32 to vector<8x32xf32>
    %c0_i32 = arith.constant 0 : i32
    %21 = arith.index_cast %c0_i32 : i32 to index
    %c0_22 = arith.constant 0 : index
    %c0_23 = arith.constant 0 : index
    %22 = vector.load %arg11[%21, %c0_22, %c0_23] : memref<8x8x128xf32, #tpu.memory_space<vmem>>, vector<1x8x128xf32>
    %23 = vector.shape_cast %22 : vector<1x8x128xf32> to vector<8x128xf32>
    %cst_24 = arith.constant dense<0.000000e+00> : vector<8x128xf32>
    %24 = tpu.matmul %19, %0, %cst_24 {dimension_numbers = #tpu.dot_dimension_numbers<[1], [0], [0], [1], [0, 0, 1, 1], [], []>} : vector<8x32xf32>, vector<32x128xf32>, vector<8x128xf32> -> vector<8x128xf32>
    %25 = arith.addf %23, %24 : vector<8x128xf32>
    %26 = vector.extract_strided_slice %25 {offsets = [0, 0], sizes = [8, 32], strides = [1, 1]} : vector<8x128xf32> to vector<8x32xf32>
    %27 = arith.negf %26 : vector<8x32xf32>
    %28 = math.exp %27 : vector<8x32xf32>
    %cst_25 = arith.constant 1.000000e+00 : f32
    %29 = vector.broadcast %cst_25 : f32 to vector<8x32xf32>
    %30 = arith.addf %29, %28 : vector<8x32xf32>
    %31 = arith.divf %29, %30 : vector<8x32xf32>
    %32 = vector.extract_strided_slice %25 {offsets = [0, 32], sizes = [8, 32], strides = [1, 1]} : vector<8x128xf32> to vector<8x32xf32>
    %33 = arith.negf %32 : vector<8x32xf32>
    %34 = math.exp %33 : vector<8x32xf32>
    %cst_26 = arith.constant 1.000000e+00 : f32
    %35 = vector.broadcast %cst_26 : f32 to vector<8x32xf32>
    %36 = arith.addf %35, %34 : vector<8x32xf32>
    %37 = arith.divf %35, %36 : vector<8x32xf32>
    %38 = vector.extract_strided_slice %25 {offsets = [0, 64], sizes = [8, 32], strides = [1, 1]} : vector<8x128xf32> to vector<8x32xf32>
    %39 = math.tanh %38 : vector<8x32xf32>
    %40 = vector.extract_strided_slice %25 {offsets = [0, 96], sizes = [8, 32], strides = [1, 1]} : vector<8x128xf32> to vector<8x32xf32>
    %41 = arith.negf %40 : vector<8x32xf32>
    %42 = math.exp %41 : vector<8x32xf32>
    %cst_27 = arith.constant 1.000000e+00 : f32
    %43 = vector.broadcast %cst_27 : f32 to vector<8x32xf32>
    %44 = arith.addf %43, %42 : vector<8x32xf32>
    %45 = arith.divf %43, %44 : vector<8x32xf32>
    %46 = arith.mulf %37, %20 : vector<8x32xf32>
    %47 = arith.mulf %31, %39 : vector<8x32xf32>
    %48 = arith.addf %46, %47 : vector<8x32xf32>
    %49 = math.tanh %48 : vector<8x32xf32>
    %50 = arith.mulf %45, %49 : vector<8x32xf32>
    %c1_i32 = arith.constant 1 : i32
    %51 = arith.index_cast %c1_i32 : i32 to index
    %c0_28 = arith.constant 0 : index
    %c0_29 = arith.constant 0 : index
    %52 = vector.load %arg11[%51, %c0_28, %c0_29] : memref<8x8x128xf32, #tpu.memory_space<vmem>>, vector<1x8x128xf32>
    %53 = vector.shape_cast %52 : vector<1x8x128xf32> to vector<8x128xf32>
    %cst_30 = arith.constant dense<0.000000e+00> : vector<8x128xf32>
    %54 = tpu.matmul %50, %0, %cst_30 {dimension_numbers = #tpu.dot_dimension_numbers<[1], [0], [0], [1], [0, 0, 1, 1], [], []>} : vector<8x32xf32>, vector<32x128xf32>, vector<8x128xf32> -> vector<8x128xf32>
    %55 = arith.addf %53, %54 : vector<8x128xf32>
    %56 = vector.extract_strided_slice %55 {offsets = [0, 0], sizes = [8, 32], strides = [1, 1]} : vector<8x128xf32> to vector<8x32xf32>
    %57 = arith.negf %56 : vector<8x32xf32>
    %58 = math.exp %57 : vector<8x32xf32>
    %cst_31 = arith.constant 1.000000e+00 : f32
    %59 = vector.broadcast %cst_31 : f32 to vector<8x32xf32>
    %60 = arith.addf %59, %58 : vector<8x32xf32>
    %61 = arith.divf %59, %60 : vector<8x32xf32>
    %62 = vector.extract_strided_slice %55 {offsets = [0, 32], sizes = [8, 32], strides = [1, 1]} : vector<8x128xf32> to vector<8x32xf32>
    %63 = arith.negf %62 : vector<8x32xf32>
    %64 = math.exp %63 : vector<8x32xf32>
    %cst_32 = arith.constant 1.000000e+00 : f32
    %65 = vector.broadcast %cst_32 : f32 to vector<8x32xf32>
    %66 = arith.addf %65, %64 : vector<8x32xf32>
    %67 = arith.divf %65, %66 : vector<8x32xf32>
    %68 = vector.extract_strided_slice %55 {offsets = [0, 64], sizes = [8, 32], strides = [1, 1]} : vector<8x128xf32> to vector<8x32xf32>
    %69 = math.tanh %68 : vector<8x32xf32>
    %70 = vector.extract_strided_slice %55 {offsets = [0, 96], sizes = [8, 32], strides = [1, 1]} : vector<8x128xf32> to vector<8x32xf32>
    %71 = arith.negf %70 : vector<8x32xf32>
    %72 = math.exp %71 : vector<8x32xf32>
    %cst_33 = arith.constant 1.000000e+00 : f32
    %73 = vector.broadcast %cst_33 : f32 to vector<8x32xf32>
    %74 = arith.addf %73, %72 : vector<8x32xf32>
    %75 = arith.divf %73, %74 : vector<8x32xf32>
    %76 = arith.mulf %67, %48 : vector<8x32xf32>
    %77 = arith.mulf %61, %69 : vector<8x32xf32>
    %78 = arith.addf %76, %77 : vector<8x32xf32>
    %79 = math.tanh %78 : vector<8x32xf32>
    %80 = arith.mulf %75, %79 : vector<8x32xf32>
    %c2_i32 = arith.constant 2 : i32
    %81 = arith.index_cast %c2_i32 : i32 to index
    %c0_34 = arith.constant 0 : index
    %c0_35 = arith.constant 0 : index
    %82 = vector.load %arg11[%81, %c0_34, %c0_35] : memref<8x8x128xf32, #tpu.memory_space<vmem>>, vector<1x8x128xf32>
    %83 = vector.shape_cast %82 : vector<1x8x128xf32> to vector<8x128xf32>
    %cst_36 = arith.constant dense<0.000000e+00> : vector<8x128xf32>
    %84 = tpu.matmul %80, %0, %cst_36 {dimension_numbers = #tpu.dot_dimension_numbers<[1], [0], [0], [1], [0, 0, 1, 1], [], []>} : vector<8x32xf32>, vector<32x128xf32>, vector<8x128xf32> -> vector<8x128xf32>
    %85 = arith.addf %83, %84 : vector<8x128xf32>
    %86 = vector.extract_strided_slice %85 {offsets = [0, 0], sizes = [8, 32], strides = [1, 1]} : vector<8x128xf32> to vector<8x32xf32>
    %87 = arith.negf %86 : vector<8x32xf32>
    %88 = math.exp %87 : vector<8x32xf32>
    %cst_37 = arith.constant 1.000000e+00 : f32
    %89 = vector.broadcast %cst_37 : f32 to vector<8x32xf32>
    %90 = arith.addf %89, %88 : vector<8x32xf32>
    %91 = arith.divf %89, %90 : vector<8x32xf32>
    %92 = vector.extract_strided_slice %85 {offsets = [0, 32], sizes = [8, 32], strides = [1, 1]} : vector<8x128xf32> to vector<8x32xf32>
    %93 = arith.negf %92 : vector<8x32xf32>
    %94 = math.exp %93 : vector<8x32xf32>
    %cst_38 = arith.constant 1.000000e+00 : f32
    %95 = vector.broadcast %cst_38 : f32 to vector<8x32xf32>
    %96 = arith.addf %95, %94 : vector<8x32xf32>
    %97 = arith.divf %95, %96 : vector<8x32xf32>
    %98 = vector.extract_strided_slice %85 {offsets = [0, 64], sizes = [8, 32], strides = [1, 1]} : vector<8x128xf32> to vector<8x32xf32>
    %99 = math.tanh %98 : vector<8x32xf32>
    %100 = vector.extract_strided_slice %85 {offsets = [0, 96], sizes = [8, 32], strides = [1, 1]} : vector<8x128xf32> to vector<8x32xf32>
    %101 = arith.negf %100 : vector<8x32xf32>
    %102 = math.exp %101 : vector<8x32xf32>
    %cst_39 = arith.constant 1.000000e+00 : f32
    %103 = vector.broadcast %cst_39 : f32 to vector<8x32xf32>
    %104 = arith.addf %103, %102 : vector<8x32xf32>
    %105 = arith.divf %103, %104 : vector<8x32xf32>
    %106 = arith.mulf %97, %78 : vector<8x32xf32>
    %107 = arith.mulf %91, %99 : vector<8x32xf32>
    %108 = arith.addf %106, %107 : vector<8x32xf32>
    %109 = math.tanh %108 : vector<8x32xf32>
    %110 = arith.mulf %105, %109 : vector<8x32xf32>
    %c3_i32 = arith.constant 3 : i32
    %111 = arith.index_cast %c3_i32 : i32 to index
    %c0_40 = arith.constant 0 : index
    %c0_41 = arith.constant 0 : index
    %112 = vector.load %arg11[%111, %c0_40, %c0_41] : memref<8x8x128xf32, #tpu.memory_space<vmem>>, vector<1x8x128xf32>
    %113 = vector.shape_cast %112 : vector<1x8x128xf32> to vector<8x128xf32>
    %cst_42 = arith.constant dense<0.000000e+00> : vector<8x128xf32>
    %114 = tpu.matmul %110, %0, %cst_42 {dimension_numbers = #tpu.dot_dimension_numbers<[1], [0], [0], [1], [0, 0, 1, 1], [], []>} : vector<8x32xf32>, vector<32x128xf32>, vector<8x128xf32> -> vector<8x128xf32>
    %115 = arith.addf %113, %114 : vector<8x128xf32>
    %116 = vector.extract_strided_slice %115 {offsets = [0, 0], sizes = [8, 32], strides = [1, 1]} : vector<8x128xf32> to vector<8x32xf32>
    %117 = arith.negf %116 : vector<8x32xf32>
    %118 = math.exp %117 : vector<8x32xf32>
    %cst_43 = arith.constant 1.000000e+00 : f32
    %119 = vector.broadcast %cst_43 : f32 to vector<8x32xf32>
    %120 = arith.addf %119, %118 : vector<8x32xf32>
    %121 = arith.divf %119, %120 : vector<8x32xf32>
    %122 = vector.extract_strided_slice %115 {offsets = [0, 32], sizes = [8, 32], strides = [1, 1]} : vector<8x128xf32> to vector<8x32xf32>
    %123 = arith.negf %122 : vector<8x32xf32>
    %124 = math.exp %123 : vector<8x32xf32>
    %cst_44 = arith.constant 1.000000e+00 : f32
    %125 = vector.broadcast %cst_44 : f32 to vector<8x32xf32>
    %126 = arith.addf %125, %124 : vector<8x32xf32>
    %127 = arith.divf %125, %126 : vector<8x32xf32>
    %128 = vector.extract_strided_slice %115 {offsets = [0, 64], sizes = [8, 32], strides = [1, 1]} : vector<8x128xf32> to vector<8x32xf32>
    %129 = math.tanh %128 : vector<8x32xf32>
    %130 = vector.extract_strided_slice %115 {offsets = [0, 96], sizes = [8, 32], strides = [1, 1]} : vector<8x128xf32> to vector<8x32xf32>
    %131 = arith.negf %130 : vector<8x32xf32>
    %132 = math.exp %131 : vector<8x32xf32>
    %cst_45 = arith.constant 1.000000e+00 : f32
    %133 = vector.broadcast %cst_45 : f32 to vector<8x32xf32>
    %134 = arith.addf %133, %132 : vector<8x32xf32>
    %135 = arith.divf %133, %134 : vector<8x32xf32>
    %136 = arith.mulf %127, %108 : vector<8x32xf32>
    %137 = arith.mulf %121, %129 : vector<8x32xf32>
    %138 = arith.addf %136, %137 : vector<8x32xf32>
    %139 = math.tanh %138 : vector<8x32xf32>
    %140 = arith.mulf %135, %139 : vector<8x32xf32>
    %c4_i32 = arith.constant 4 : i32
    %141 = arith.index_cast %c4_i32 : i32 to index
    %c0_46 = arith.constant 0 : index
    %c0_47 = arith.constant 0 : index
    %142 = vector.load %arg11[%141, %c0_46, %c0_47] : memref<8x8x128xf32, #tpu.memory_space<vmem>>, vector<1x8x128xf32>
    %143 = vector.shape_cast %142 : vector<1x8x128xf32> to vector<8x128xf32>
    %cst_48 = arith.constant dense<0.000000e+00> : vector<8x128xf32>
    %144 = tpu.matmul %140, %0, %cst_48 {dimension_numbers = #tpu.dot_dimension_numbers<[1], [0], [0], [1], [0, 0, 1, 1], [], []>} : vector<8x32xf32>, vector<32x128xf32>, vector<8x128xf32> -> vector<8x128xf32>
    %145 = arith.addf %143, %144 : vector<8x128xf32>
    %146 = vector.extract_strided_slice %145 {offsets = [0, 0], sizes = [8, 32], strides = [1, 1]} : vector<8x128xf32> to vector<8x32xf32>
    %147 = arith.negf %146 : vector<8x32xf32>
    %148 = math.exp %147 : vector<8x32xf32>
    %cst_49 = arith.constant 1.000000e+00 : f32
    %149 = vector.broadcast %cst_49 : f32 to vector<8x32xf32>
    %150 = arith.addf %149, %148 : vector<8x32xf32>
    %151 = arith.divf %149, %150 : vector<8x32xf32>
    %152 = vector.extract_strided_slice %145 {offsets = [0, 32], sizes = [8, 32], strides = [1, 1]} : vector<8x128xf32> to vector<8x32xf32>
    %153 = arith.negf %152 : vector<8x32xf32>
    %154 = math.exp %153 : vector<8x32xf32>
    %cst_50 = arith.constant 1.000000e+00 : f32
    %155 = vector.broadcast %cst_50 : f32 to vector<8x32xf32>
    %156 = arith.addf %155, %154 : vector<8x32xf32>
    %157 = arith.divf %155, %156 : vector<8x32xf32>
    %158 = vector.extract_strided_slice %145 {offsets = [0, 64], sizes = [8, 32], strides = [1, 1]} : vector<8x128xf32> to vector<8x32xf32>
    %159 = math.tanh %158 : vector<8x32xf32>
    %160 = vector.extract_strided_slice %145 {offsets = [0, 96], sizes = [8, 32], strides = [1, 1]} : vector<8x128xf32> to vector<8x32xf32>
    %161 = arith.negf %160 : vector<8x32xf32>
    %162 = math.exp %161 : vector<8x32xf32>
    %cst_51 = arith.constant 1.000000e+00 : f32
    %163 = vector.broadcast %cst_51 : f32 to vector<8x32xf32>
    %164 = arith.addf %163, %162 : vector<8x32xf32>
    %165 = arith.divf %163, %164 : vector<8x32xf32>
    %166 = arith.mulf %157, %138 : vector<8x32xf32>
    %167 = arith.mulf %151, %159 : vector<8x32xf32>
    %168 = arith.addf %166, %167 : vector<8x32xf32>
    %169 = math.tanh %168 : vector<8x32xf32>
    %170 = arith.mulf %165, %169 : vector<8x32xf32>
    %c5_i32 = arith.constant 5 : i32
    %171 = arith.index_cast %c5_i32 : i32 to index
    %c0_52 = arith.constant 0 : index
    %c0_53 = arith.constant 0 : index
    %172 = vector.load %arg11[%171, %c0_52, %c0_53] : memref<8x8x128xf32, #tpu.memory_space<vmem>>, vector<1x8x128xf32>
    %173 = vector.shape_cast %172 : vector<1x8x128xf32> to vector<8x128xf32>
    %cst_54 = arith.constant dense<0.000000e+00> : vector<8x128xf32>
    %174 = tpu.matmul %170, %0, %cst_54 {dimension_numbers = #tpu.dot_dimension_numbers<[1], [0], [0], [1], [0, 0, 1, 1], [], []>} : vector<8x32xf32>, vector<32x128xf32>, vector<8x128xf32> -> vector<8x128xf32>
    %175 = arith.addf %173, %174 : vector<8x128xf32>
    %176 = vector.extract_strided_slice %175 {offsets = [0, 0], sizes = [8, 32], strides = [1, 1]} : vector<8x128xf32> to vector<8x32xf32>
    %177 = arith.negf %176 : vector<8x32xf32>
    %178 = math.exp %177 : vector<8x32xf32>
    %cst_55 = arith.constant 1.000000e+00 : f32
    %179 = vector.broadcast %cst_55 : f32 to vector<8x32xf32>
    %180 = arith.addf %179, %178 : vector<8x32xf32>
    %181 = arith.divf %179, %180 : vector<8x32xf32>
    %182 = vector.extract_strided_slice %175 {offsets = [0, 32], sizes = [8, 32], strides = [1, 1]} : vector<8x128xf32> to vector<8x32xf32>
    %183 = arith.negf %182 : vector<8x32xf32>
    %184 = math.exp %183 : vector<8x32xf32>
    %cst_56 = arith.constant 1.000000e+00 : f32
    %185 = vector.broadcast %cst_56 : f32 to vector<8x32xf32>
    %186 = arith.addf %185, %184 : vector<8x32xf32>
    %187 = arith.divf %185, %186 : vector<8x32xf32>
    %188 = vector.extract_strided_slice %175 {offsets = [0, 64], sizes = [8, 32], strides = [1, 1]} : vector<8x128xf32> to vector<8x32xf32>
    %189 = math.tanh %188 : vector<8x32xf32>
    %190 = vector.extract_strided_slice %175 {offsets = [0, 96], sizes = [8, 32], strides = [1, 1]} : vector<8x128xf32> to vector<8x32xf32>
    %191 = arith.negf %190 : vector<8x32xf32>
    %192 = math.exp %191 : vector<8x32xf32>
    %cst_57 = arith.constant 1.000000e+00 : f32
    %193 = vector.broadcast %cst_57 : f32 to vector<8x32xf32>
    %194 = arith.addf %193, %192 : vector<8x32xf32>
    %195 = arith.divf %193, %194 : vector<8x32xf32>
    %196 = arith.mulf %187, %168 : vector<8x32xf32>
    %197 = arith.mulf %181, %189 : vector<8x32xf32>
    %198 = arith.addf %196, %197 : vector<8x32xf32>
    %199 = math.tanh %198 : vector<8x32xf32>
    %200 = arith.mulf %195, %199 : vector<8x32xf32>
    %c6_i32 = arith.constant 6 : i32
    %201 = arith.index_cast %c6_i32 : i32 to index
    %c0_58 = arith.constant 0 : index
    %c0_59 = arith.constant 0 : index
    %202 = vector.load %arg11[%201, %c0_58, %c0_59] : memref<8x8x128xf32, #tpu.memory_space<vmem>>, vector<1x8x128xf32>
    %203 = vector.shape_cast %202 : vector<1x8x128xf32> to vector<8x128xf32>
    %cst_60 = arith.constant dense<0.000000e+00> : vector<8x128xf32>
    %204 = tpu.matmul %200, %0, %cst_60 {dimension_numbers = #tpu.dot_dimension_numbers<[1], [0], [0], [1], [0, 0, 1, 1], [], []>} : vector<8x32xf32>, vector<32x128xf32>, vector<8x128xf32> -> vector<8x128xf32>
    %205 = arith.addf %203, %204 : vector<8x128xf32>
    %206 = vector.extract_strided_slice %205 {offsets = [0, 0], sizes = [8, 32], strides = [1, 1]} : vector<8x128xf32> to vector<8x32xf32>
    %207 = arith.negf %206 : vector<8x32xf32>
    %208 = math.exp %207 : vector<8x32xf32>
    %cst_61 = arith.constant 1.000000e+00 : f32
    %209 = vector.broadcast %cst_61 : f32 to vector<8x32xf32>
    %210 = arith.addf %209, %208 : vector<8x32xf32>
    %211 = arith.divf %209, %210 : vector<8x32xf32>
    %212 = vector.extract_strided_slice %205 {offsets = [0, 32], sizes = [8, 32], strides = [1, 1]} : vector<8x128xf32> to vector<8x32xf32>
    %213 = arith.negf %212 : vector<8x32xf32>
    %214 = math.exp %213 : vector<8x32xf32>
    %cst_62 = arith.constant 1.000000e+00 : f32
    %215 = vector.broadcast %cst_62 : f32 to vector<8x32xf32>
    %216 = arith.addf %215, %214 : vector<8x32xf32>
    %217 = arith.divf %215, %216 : vector<8x32xf32>
    %218 = vector.extract_strided_slice %205 {offsets = [0, 64], sizes = [8, 32], strides = [1, 1]} : vector<8x128xf32> to vector<8x32xf32>
    %219 = math.tanh %218 : vector<8x32xf32>
    %220 = vector.extract_strided_slice %205 {offsets = [0, 96], sizes = [8, 32], strides = [1, 1]} : vector<8x128xf32> to vector<8x32xf32>
    %221 = arith.negf %220 : vector<8x32xf32>
    %222 = math.exp %221 : vector<8x32xf32>
    %cst_63 = arith.constant 1.000000e+00 : f32
    %223 = vector.broadcast %cst_63 : f32 to vector<8x32xf32>
    %224 = arith.addf %223, %222 : vector<8x32xf32>
    %225 = arith.divf %223, %224 : vector<8x32xf32>
    %226 = arith.mulf %217, %198 : vector<8x32xf32>
    %227 = arith.mulf %211, %219 : vector<8x32xf32>
    %228 = arith.addf %226, %227 : vector<8x32xf32>
    %229 = math.tanh %228 : vector<8x32xf32>
    %230 = arith.mulf %225, %229 : vector<8x32xf32>
    %c7_i32 = arith.constant 7 : i32
    %231 = arith.index_cast %c7_i32 : i32 to index
    %c0_64 = arith.constant 0 : index
    %c0_65 = arith.constant 0 : index
    %232 = vector.load %arg11[%231, %c0_64, %c0_65] : memref<8x8x128xf32, #tpu.memory_space<vmem>>, vector<1x8x128xf32>
    %233 = vector.shape_cast %232 : vector<1x8x128xf32> to vector<8x128xf32>
    %cst_66 = arith.constant dense<0.000000e+00> : vector<8x128xf32>
    %234 = tpu.matmul %230, %0, %cst_66 {dimension_numbers = #tpu.dot_dimension_numbers<[1], [0], [0], [1], [0, 0, 1, 1], [], []>} : vector<8x32xf32>, vector<32x128xf32>, vector<8x128xf32> -> vector<8x128xf32>
    %235 = arith.addf %233, %234 : vector<8x128xf32>
    %236 = vector.extract_strided_slice %235 {offsets = [0, 0], sizes = [8, 32], strides = [1, 1]} : vector<8x128xf32> to vector<8x32xf32>
    %237 = arith.negf %236 : vector<8x32xf32>
    %238 = math.exp %237 : vector<8x32xf32>
    %cst_67 = arith.constant 1.000000e+00 : f32
    %239 = vector.broadcast %cst_67 : f32 to vector<8x32xf32>
    %240 = arith.addf %239, %238 : vector<8x32xf32>
    %241 = arith.divf %239, %240 : vector<8x32xf32>
    %242 = vector.extract_strided_slice %235 {offsets = [0, 32], sizes = [8, 32], strides = [1, 1]} : vector<8x128xf32> to vector<8x32xf32>
    %243 = arith.negf %242 : vector<8x32xf32>
    %244 = math.exp %243 : vector<8x32xf32>
    %cst_68 = arith.constant 1.000000e+00 : f32
    %245 = vector.broadcast %cst_68 : f32 to vector<8x32xf32>
    %246 = arith.addf %245, %244 : vector<8x32xf32>
    %247 = arith.divf %245, %246 : vector<8x32xf32>
    %248 = vector.extract_strided_slice %235 {offsets = [0, 64], sizes = [8, 32], strides = [1, 1]} : vector<8x128xf32> to vector<8x32xf32>
    %249 = math.tanh %248 : vector<8x32xf32>
    %250 = vector.extract_strided_slice %235 {offsets = [0, 96], sizes = [8, 32], strides = [1, 1]} : vector<8x128xf32> to vector<8x32xf32>
    %251 = arith.negf %250 : vector<8x32xf32>
    %252 = math.exp %251 : vector<8x32xf32>
    %cst_69 = arith.constant 1.000000e+00 : f32
    %253 = vector.broadcast %cst_69 : f32 to vector<8x32xf32>
    %254 = arith.addf %253, %252 : vector<8x32xf32>
    %255 = arith.divf %253, %254 : vector<8x32xf32>
    %256 = arith.mulf %247, %228 : vector<8x32xf32>
    %257 = arith.mulf %241, %249 : vector<8x32xf32>
    %258 = arith.addf %256, %257 : vector<8x32xf32>
    %259 = math.tanh %258 : vector<8x32xf32>
    %260 = arith.mulf %255, %259 : vector<8x32xf32>
    %c8_i32 = arith.constant 8 : i32
    %cst_70 = arith.constant 0.000000e+00 : f32
    %261 = vector.broadcast %cst_70 : f32 to vector<8x8xf32>
    %c0_i32_71 = arith.constant 0 : i32
    %cst_72 = arith.constant dense<0.000000e+00> : vector<8x128xf32>
    %262 = tpu.matmul %261, %1, %cst_72 {dimension_numbers = #tpu.dot_dimension_numbers<[1], [0], [0], [1], [0, 0, 1, 1], [], []>} : vector<8x8xf32>, vector<8x128xf32>, vector<8x128xf32> -> vector<8x128xf32>
    %cst_73 = arith.constant dense<0.000000e+00> : vector<8x128xf32>
    %263 = tpu.matmul %260, %2, %cst_73 {dimension_numbers = #tpu.dot_dimension_numbers<[1], [0], [0], [1], [0, 0, 1, 1], [], []>} : vector<8x32xf32>, vector<32x128xf32>, vector<8x128xf32> -> vector<8x128xf32>
    %264 = arith.addf %262, %263 : vector<8x128xf32>
    %265 = arith.addf %264, %6 : vector<8x128xf32>
    %266 = vector.extract_strided_slice %265 {offsets = [0, 0], sizes = [8, 32], strides = [1, 1]} : vector<8x128xf32> to vector<8x32xf32>
    %267 = arith.negf %266 : vector<8x32xf32>
    %268 = math.exp %267 : vector<8x32xf32>
    %cst_74 = arith.constant 1.000000e+00 : f32
    %269 = vector.broadcast %cst_74 : f32 to vector<8x32xf32>
    %270 = arith.addf %269, %268 : vector<8x32xf32>
    %271 = arith.divf %269, %270 : vector<8x32xf32>
    %272 = vector.extract_strided_slice %265 {offsets = [0, 32], sizes = [8, 32], strides = [1, 1]} : vector<8x128xf32> to vector<8x32xf32>
    %273 = arith.negf %272 : vector<8x32xf32>
    %274 = math.exp %273 : vector<8x32xf32>
    %cst_75 = arith.constant 1.000000e+00 : f32
    %275 = vector.broadcast %cst_75 : f32 to vector<8x32xf32>
    %276 = arith.addf %275, %274 : vector<8x32xf32>
    %277 = arith.divf %275, %276 : vector<8x32xf32>
    %278 = vector.extract_strided_slice %265 {offsets = [0, 64], sizes = [8, 32], strides = [1, 1]} : vector<8x128xf32> to vector<8x32xf32>
    %279 = math.tanh %278 : vector<8x32xf32>
    %280 = vector.extract_strided_slice %265 {offsets = [0, 96], sizes = [8, 32], strides = [1, 1]} : vector<8x128xf32> to vector<8x32xf32>
    %281 = arith.negf %280 : vector<8x32xf32>
    %282 = math.exp %281 : vector<8x32xf32>
    %cst_76 = arith.constant 1.000000e+00 : f32
    %283 = vector.broadcast %cst_76 : f32 to vector<8x32xf32>
    %284 = arith.addf %283, %282 : vector<8x32xf32>
    %285 = arith.divf %283, %284 : vector<8x32xf32>
    %286 = arith.mulf %277, %258 : vector<8x32xf32>
    %287 = arith.mulf %271, %279 : vector<8x32xf32>
    %288 = arith.addf %286, %287 : vector<8x32xf32>
    %289 = math.tanh %288 : vector<8x32xf32>
    %290 = arith.mulf %285, %289 : vector<8x32xf32>
    %cst_77 = arith.constant dense<0.000000e+00> : vector<8x8xf32>
    %291 = tpu.matmul %290, %3, %cst_77 {dimension_numbers = #tpu.dot_dimension_numbers<[1], [0], [0], [1], [0, 0, 1, 1], [], []>} : vector<8x32xf32>, vector<32x8xf32>, vector<8x8xf32> -> vector<8x8xf32>
    %292 = arith.addf %291, %9 : vector<8x8xf32>
    %293 = arith.index_cast %c0_i32_71 : i32 to index
    %c0_78 = arith.constant 0 : index
    %c0_79 = arith.constant 0 : index
    %294 = vector.load %arg10[%293, %c0_78, %c0_79] : memref<5x8x8xf32, #tpu.memory_space<vmem>>, vector<1x8x8xf32>
    %295 = vector.shape_cast %294 : vector<1x8x8xf32> to vector<8x8xf32>
    %296 = vector.shape_cast %292 : vector<8x8xf32> to vector<1x8x8xf32>
    tpu.vector_store %arg10[%293, %c0_78, %c0_79], %296 {strides = array<i32>} : memref<5x8x8xf32, #tpu.memory_space<vmem>>, vector<1x8x8xf32>,
    %c1_i32_80 = arith.constant 1 : i32
    %cst_81 = arith.constant dense<0.000000e+00> : vector<8x128xf32>
    %297 = tpu.matmul %292, %1, %cst_81 {dimension_numbers = #tpu.dot_dimension_numbers<[1], [0], [0], [1], [0, 0, 1, 1], [], []>} : vector<8x8xf32>, vector<8x128xf32>, vector<8x128xf32> -> vector<8x128xf32>
    %cst_82 = arith.constant dense<0.000000e+00> : vector<8x128xf32>
    %298 = tpu.matmul %290, %2, %cst_82 {dimension_numbers = #tpu.dot_dimension_numbers<[1], [0], [0], [1], [0, 0, 1, 1], [], []>} : vector<8x32xf32>, vector<32x128xf32>, vector<8x128xf32> -> vector<8x128xf32>
    %299 = arith.addf %297, %298 : vector<8x128xf32>
    %300 = arith.addf %299, %6 : vector<8x128xf32>
    %301 = vector.extract_strided_slice %300 {offsets = [0, 0], sizes = [8, 32], strides = [1, 1]} : vector<8x128xf32> to vector<8x32xf32>
    %302 = arith.negf %301 : vector<8x32xf32>
    %303 = math.exp %302 : vector<8x32xf32>
    %cst_83 = arith.constant 1.000000e+00 : f32
    %304 = vector.broadcast %cst_83 : f32 to vector<8x32xf32>
    %305 = arith.addf %304, %303 : vector<8x32xf32>
    %306 = arith.divf %304, %305 : vector<8x32xf32>
    %307 = vector.extract_strided_slice %300 {offsets = [0, 32], sizes = [8, 32], strides = [1, 1]} : vector<8x128xf32> to vector<8x32xf32>
    %308 = arith.negf %307 : vector<8x32xf32>
    %309 = math.exp %308 : vector<8x32xf32>
    %cst_84 = arith.constant 1.000000e+00 : f32
    %310 = vector.broadcast %cst_84 : f32 to vector<8x32xf32>
    %311 = arith.addf %310, %309 : vector<8x32xf32>
    %312 = arith.divf %310, %311 : vector<8x32xf32>
    %313 = vector.extract_strided_slice %300 {offsets = [0, 64], sizes = [8, 32], strides = [1, 1]} : vector<8x128xf32> to vector<8x32xf32>
    %314 = math.tanh %313 : vector<8x32xf32>
    %315 = vector.extract_strided_slice %300 {offsets = [0, 96], sizes = [8, 32], strides = [1, 1]} : vector<8x128xf32> to vector<8x32xf32>
    %316 = arith.negf %315 : vector<8x32xf32>
    %317 = math.exp %316 : vector<8x32xf32>
    %cst_85 = arith.constant 1.000000e+00 : f32
    %318 = vector.broadcast %cst_85 : f32 to vector<8x32xf32>
    %319 = arith.addf %318, %317 : vector<8x32xf32>
    %320 = arith.divf %318, %319 : vector<8x32xf32>
    %321 = arith.mulf %312, %288 : vector<8x32xf32>
    %322 = arith.mulf %306, %314 : vector<8x32xf32>
    %323 = arith.addf %321, %322 : vector<8x32xf32>
    %324 = math.tanh %323 : vector<8x32xf32>
    %325 = arith.mulf %320, %324 : vector<8x32xf32>
    %cst_86 = arith.constant dense<0.000000e+00> : vector<8x8xf32>
    %326 = tpu.matmul %325, %3, %cst_86 {dimension_numbers = #tpu.dot_dimension_numbers<[1], [0], [0], [1], [0, 0, 1, 1], [], []>} : vector<8x32xf32>, vector<32x8xf32>, vector<8x8xf32> -> vector<8x8xf32>
    %327 = arith.addf %326, %9 : vector<8x8xf32>
    %328 = arith.index_cast %c1_i32_80 : i32 to index
    %c0_87 = arith.constant 0 : index
    %c0_88 = arith.constant 0 : index
    %329 = vector.load %arg10[%328, %c0_87, %c0_88] : memref<5x8x8xf32, #tpu.memory_space<vmem>>, vector<1x8x8xf32>
    %330 = vector.shape_cast %329 : vector<1x8x8xf32> to vector<8x8xf32>
    %331 = vector.shape_cast %327 : vector<8x8xf32> to vector<1x8x8xf32>
    tpu.vector_store %arg10[%328, %c0_87, %c0_88], %331 {strides = array<i32>} : memref<5x8x8xf32, #tpu.memory_space<vmem>>, vector<1x8x8xf32>,
    %c2_i32_89 = arith.constant 2 : i32
    %cst_90 = arith.constant dense<0.000000e+00> : vector<8x128xf32>
    %332 = tpu.matmul %327, %1, %cst_90 {dimension_numbers = #tpu.dot_dimension_numbers<[1], [0], [0], [1], [0, 0, 1, 1], [], []>} : vector<8x8xf32>, vector<8x128xf32>, vector<8x128xf32> -> vector<8x128xf32>
    %cst_91 = arith.constant dense<0.000000e+00> : vector<8x128xf32>
    %333 = tpu.matmul %325, %2, %cst_91 {dimension_numbers = #tpu.dot_dimension_numbers<[1], [0], [0], [1], [0, 0, 1, 1], [], []>} : vector<8x32xf32>, vector<32x128xf32>, vector<8x128xf32> -> vector<8x128xf32>
    %334 = arith.addf %332, %333 : vector<8x128xf32>
    %335 = arith.addf %334, %6 : vector<8x128xf32>
    %336 = vector.extract_strided_slice %335 {offsets = [0, 0], sizes = [8, 32], strides = [1, 1]} : vector<8x128xf32> to vector<8x32xf32>
    %337 = arith.negf %336 : vector<8x32xf32>
    %338 = math.exp %337 : vector<8x32xf32>
    %cst_92 = arith.constant 1.000000e+00 : f32
    %339 = vector.broadcast %cst_92 : f32 to vector<8x32xf32>
    %340 = arith.addf %339, %338 : vector<8x32xf32>
    %341 = arith.divf %339, %340 : vector<8x32xf32>
    %342 = vector.extract_strided_slice %335 {offsets = [0, 32], sizes = [8, 32], strides = [1, 1]} : vector<8x128xf32> to vector<8x32xf32>
    %343 = arith.negf %342 : vector<8x32xf32>
    %344 = math.exp %343 : vector<8x32xf32>
    %cst_93 = arith.constant 1.000000e+00 : f32
    %345 = vector.broadcast %cst_93 : f32 to vector<8x32xf32>
    %346 = arith.addf %345, %344 : vector<8x32xf32>
    %347 = arith.divf %345, %346 : vector<8x32xf32>
    %348 = vector.extract_strided_slice %335 {offsets = [0, 64], sizes = [8, 32], strides = [1, 1]} : vector<8x128xf32> to vector<8x32xf32>
    %349 = math.tanh %348 : vector<8x32xf32>
    %350 = vector.extract_strided_slice %335 {offsets = [0, 96], sizes = [8, 32], strides = [1, 1]} : vector<8x128xf32> to vector<8x32xf32>
    %351 = arith.negf %350 : vector<8x32xf32>
    %352 = math.exp %351 : vector<8x32xf32>
    %cst_94 = arith.constant 1.000000e+00 : f32
    %353 = vector.broadcast %cst_94 : f32 to vector<8x32xf32>
    %354 = arith.addf %353, %352 : vector<8x32xf32>
    %355 = arith.divf %353, %354 : vector<8x32xf32>
    %356 = arith.mulf %347, %323 : vector<8x32xf32>
    %357 = arith.mulf %341, %349 : vector<8x32xf32>
    %358 = arith.addf %356, %357 : vector<8x32xf32>
    %359 = math.tanh %358 : vector<8x32xf32>
    %360 = arith.mulf %355, %359 : vector<8x32xf32>
    %cst_95 = arith.constant dense<0.000000e+00> : vector<8x8xf32>
    %361 = tpu.matmul %360, %3, %cst_95 {dimension_numbers = #tpu.dot_dimension_numbers<[1], [0], [0], [1], [0, 0, 1, 1], [], []>} : vector<8x32xf32>, vector<32x8xf32>, vector<8x8xf32> -> vector<8x8xf32>
    %362 = arith.addf %361, %9 : vector<8x8xf32>
    %363 = arith.index_cast %c2_i32_89 : i32 to index
    %c0_96 = arith.constant 0 : index
    %c0_97 = arith.constant 0 : index
    %364 = vector.load %arg10[%363, %c0_96, %c0_97] : memref<5x8x8xf32, #tpu.memory_space<vmem>>, vector<1x8x8xf32>
    %365 = vector.shape_cast %364 : vector<1x8x8xf32> to vector<8x8xf32>
    %366 = vector.shape_cast %362 : vector<8x8xf32> to vector<1x8x8xf32>
    tpu.vector_store %arg10[%363, %c0_96, %c0_97], %366 {strides = array<i32>} : memref<5x8x8xf32, #tpu.memory_space<vmem>>, vector<1x8x8xf32>,
    %c3_i32_98 = arith.constant 3 : i32
    %cst_99 = arith.constant dense<0.000000e+00> : vector<8x128xf32>
    %367 = tpu.matmul %362, %1, %cst_99 {dimension_numbers = #tpu.dot_dimension_numbers<[1], [0], [0], [1], [0, 0, 1, 1], [], []>} : vector<8x8xf32>, vector<8x128xf32>, vector<8x128xf32> -> vector<8x128xf32>
    %cst_100 = arith.constant dense<0.000000e+00> : vector<8x128xf32>
    %368 = tpu.matmul %360, %2, %cst_100 {dimension_numbers = #tpu.dot_dimension_numbers<[1], [0], [0], [1], [0, 0, 1, 1], [], []>} : vector<8x32xf32>, vector<32x128xf32>, vector<8x128xf32> -> vector<8x128xf32>
    %369 = arith.addf %367, %368 : vector<8x128xf32>
    %370 = arith.addf %369, %6 : vector<8x128xf32>
    %371 = vector.extract_strided_slice %370 {offsets = [0, 0], sizes = [8, 32], strides = [1, 1]} : vector<8x128xf32> to vector<8x32xf32>
    %372 = arith.negf %371 : vector<8x32xf32>
    %373 = math.exp %372 : vector<8x32xf32>
    %cst_101 = arith.constant 1.000000e+00 : f32
    %374 = vector.broadcast %cst_101 : f32 to vector<8x32xf32>
    %375 = arith.addf %374, %373 : vector<8x32xf32>
    %376 = arith.divf %374, %375 : vector<8x32xf32>
    %377 = vector.extract_strided_slice %370 {offsets = [0, 32], sizes = [8, 32], strides = [1, 1]} : vector<8x128xf32> to vector<8x32xf32>
    %378 = arith.negf %377 : vector<8x32xf32>
    %379 = math.exp %378 : vector<8x32xf32>
    %cst_102 = arith.constant 1.000000e+00 : f32
    %380 = vector.broadcast %cst_102 : f32 to vector<8x32xf32>
    %381 = arith.addf %380, %379 : vector<8x32xf32>
    %382 = arith.divf %380, %381 : vector<8x32xf32>
    %383 = vector.extract_strided_slice %370 {offsets = [0, 64], sizes = [8, 32], strides = [1, 1]} : vector<8x128xf32> to vector<8x32xf32>
    %384 = math.tanh %383 : vector<8x32xf32>
    %385 = vector.extract_strided_slice %370 {offsets = [0, 96], sizes = [8, 32], strides = [1, 1]} : vector<8x128xf32> to vector<8x32xf32>
    %386 = arith.negf %385 : vector<8x32xf32>
    %387 = math.exp %386 : vector<8x32xf32>
    %cst_103 = arith.constant 1.000000e+00 : f32
    %388 = vector.broadcast %cst_103 : f32 to vector<8x32xf32>
    %389 = arith.addf %388, %387 : vector<8x32xf32>
    %390 = arith.divf %388, %389 : vector<8x32xf32>
    %391 = arith.mulf %382, %358 : vector<8x32xf32>
    %392 = arith.mulf %376, %384 : vector<8x32xf32>
    %393 = arith.addf %391, %392 : vector<8x32xf32>
    %394 = math.tanh %393 : vector<8x32xf32>
    %395 = arith.mulf %390, %394 : vector<8x32xf32>
    %cst_104 = arith.constant dense<0.000000e+00> : vector<8x8xf32>
    %396 = tpu.matmul %395, %3, %cst_104 {dimension_numbers = #tpu.dot_dimension_numbers<[1], [0], [0], [1], [0, 0, 1, 1], [], []>} : vector<8x32xf32>, vector<32x8xf32>, vector<8x8xf32> -> vector<8x8xf32>
    %397 = arith.addf %396, %9 : vector<8x8xf32>
    %398 = arith.index_cast %c3_i32_98 : i32 to index
    %c0_105 = arith.constant 0 : index
    %c0_106 = arith.constant 0 : index
    %399 = vector.load %arg10[%398, %c0_105, %c0_106] : memref<5x8x8xf32, #tpu.memory_space<vmem>>, vector<1x8x8xf32>
    %400 = vector.shape_cast %399 : vector<1x8x8xf32> to vector<8x8xf32>
    %401 = vector.shape_cast %397 : vector<8x8xf32> to vector<1x8x8xf32>
    tpu.vector_store %arg10[%398, %c0_105, %c0_106], %401 {strides = array<i32>} : memref<5x8x8xf32, #tpu.memory_space<vmem>>, vector<1x8x8xf32>,
    %c4_i32_107 = arith.constant 4 : i32
    %cst_108 = arith.constant dense<0.000000e+00> : vector<8x128xf32>
    %402 = tpu.matmul %397, %1, %cst_108 {dimension_numbers = #tpu.dot_dimension_numbers<[1], [0], [0], [1], [0, 0, 1, 1], [], []>} : vector<8x8xf32>, vector<8x128xf32>, vector<8x128xf32> -> vector<8x128xf32>
    %cst_109 = arith.constant dense<0.000000e+00> : vector<8x128xf32>
    %403 = tpu.matmul %395, %2, %cst_109 {dimension_numbers = #tpu.dot_dimension_numbers<[1], [0], [0], [1], [0, 0, 1, 1], [], []>} : vector<8x32xf32>, vector<32x128xf32>, vector<8x128xf32> -> vector<8x128xf32>
    %404 = arith.addf %402, %403 : vector<8x128xf32>
    %405 = arith.addf %404, %6 : vector<8x128xf32>
    %406 = vector.extract_strided_slice %405 {offsets = [0, 0], sizes = [8, 32], strides = [1, 1]} : vector<8x128xf32> to vector<8x32xf32>
    %407 = arith.negf %406 : vector<8x32xf32>
    %408 = math.exp %407 : vector<8x32xf32>
    %cst_110 = arith.constant 1.000000e+00 : f32
    %409 = vector.broadcast %cst_110 : f32 to vector<8x32xf32>
    %410 = arith.addf %409, %408 : vector<8x32xf32>
    %411 = arith.divf %409, %410 : vector<8x32xf32>
    %412 = vector.extract_strided_slice %405 {offsets = [0, 32], sizes = [8, 32], strides = [1, 1]} : vector<8x128xf32> to vector<8x32xf32>
    %413 = arith.negf %412 : vector<8x32xf32>
    %414 = math.exp %413 : vector<8x32xf32>
    %cst_111 = arith.constant 1.000000e+00 : f32
    %415 = vector.broadcast %cst_111 : f32 to vector<8x32xf32>
    %416 = arith.addf %415, %414 : vector<8x32xf32>
    %417 = arith.divf %415, %416 : vector<8x32xf32>
    %418 = vector.extract_strided_slice %405 {offsets = [0, 64], sizes = [8, 32], strides = [1, 1]} : vector<8x128xf32> to vector<8x32xf32>
    %419 = math.tanh %418 : vector<8x32xf32>
    %420 = vector.extract_strided_slice %405 {offsets = [0, 96], sizes = [8, 32], strides = [1, 1]} : vector<8x128xf32> to vector<8x32xf32>
    %421 = arith.negf %420 : vector<8x32xf32>
    %422 = math.exp %421 : vector<8x32xf32>
    %cst_112 = arith.constant 1.000000e+00 : f32
    %423 = vector.broadcast %cst_112 : f32 to vector<8x32xf32>
    %424 = arith.addf %423, %422 : vector<8x32xf32>
    %425 = arith.divf %423, %424 : vector<8x32xf32>
    %426 = arith.mulf %417, %393 : vector<8x32xf32>
    %427 = arith.mulf %411, %419 : vector<8x32xf32>
    %428 = arith.addf %426, %427 : vector<8x32xf32>
    %429 = math.tanh %428 : vector<8x32xf32>
    %430 = arith.mulf %425, %429 : vector<8x32xf32>
    %cst_113 = arith.constant dense<0.000000e+00> : vector<8x8xf32>
    %431 = tpu.matmul %430, %3, %cst_113 {dimension_numbers = #tpu.dot_dimension_numbers<[1], [0], [0], [1], [0, 0, 1, 1], [], []>} : vector<8x32xf32>, vector<32x8xf32>, vector<8x8xf32> -> vector<8x8xf32>
    %432 = arith.addf %431, %9 : vector<8x8xf32>
    %433 = arith.index_cast %c4_i32_107 : i32 to index
    %c0_114 = arith.constant 0 : index
    %c0_115 = arith.constant 0 : index
    %434 = vector.load %arg10[%433, %c0_114, %c0_115] : memref<5x8x8xf32, #tpu.memory_space<vmem>>, vector<1x8x8xf32>
    %435 = vector.shape_cast %434 : vector<1x8x8xf32> to vector<8x8xf32>
    %436 = vector.shape_cast %432 : vector<8x8xf32> to vector<1x8x8xf32>
    tpu.vector_store %arg10[%433, %c0_114, %c0_115], %436 {strides = array<i32>} : memref<5x8x8xf32, #tpu.memory_space<vmem>>, vector<1x8x8xf32>,
    %c5_i32_116 = arith.constant 5 : i32
    return
  }
  func.func @transform_0(%arg0: i32) -> (i32, i32) {
    %c0_i32 = arith.constant 0 : i32
    %c0_i32_0 = arith.constant 0 : i32
    %c0_i32_1 = arith.constant 0 : i32
    return %c0_i32, %c0_i32_0 : i32, i32
  }
  func.func @transform_1(%arg0: i32) -> (i32, i32) {
    %c0_i32 = arith.constant 0 : i32
    %c0_i32_0 = arith.constant 0 : i32
    %c0_i32_1 = arith.constant 0 : i32
    return %c0_i32, %c0_i32_0 : i32, i32
  }
  func.func @transform_2(%arg0: i32) -> (i32, i32) {
    %c0_i32 = arith.constant 0 : i32
    %c0_i32_0 = arith.constant 0 : i32
    %c0_i32_1 = arith.constant 0 : i32
    return %c0_i32, %c0_i32_0 : i32, i32
  }
  func.func @transform_3(%arg0: i32) -> (i32, i32) {
    %c0_i32 = arith.constant 0 : i32
    %c0_i32_0 = arith.constant 0 : i32
    %c0_i32_1 = arith.constant 0 : i32
    return %c0_i32, %c0_i32_0 : i32, i32
  }
  func.func @transform_4(%arg0: i32) -> (i32, i32) {
    %c0_i32 = arith.constant 0 : i32
    %c0_i32_0 = arith.constant 0 : i32
    %c0_i32_1 = arith.constant 0 : i32
    return %c0_i32, %c0_i32_0 : i32, i32
  }
  func.func @transform_5(%arg0: i32) -> (i32, i32) {
    %c0_i32 = arith.constant 0 : i32
    %c0_i32_0 = arith.constant 0 : i32
    %c0_i32_1 = arith.constant 0 : i32
    return %c0_i32, %c0_i32_0 : i32, i32
  }
  func.func @transform_6(%arg0: i32) -> (i32, i32) {
    %c0_i32 = arith.constant 0 : i32
    %c0_i32_0 = arith.constant 0 : i32
    %c0_i32_1 = arith.constant 0 : i32
    return %c0_i32, %c0_i32_0 : i32, i32
  }
  func.func @transform_7(%arg0: i32) -> (i32, i32) {
    %c0_i32 = arith.constant 0 : i32
    %c0_i32_0 = arith.constant 0 : i32
    %c0_i32_1 = arith.constant 0 : i32
    return %c0_i32, %c0_i32_0 : i32, i32
  }
  func.func @transform_8(%arg0: i32) -> (i32, i32) {
    %c0_i32 = arith.constant 0 : i32
    %c0_i32_0 = arith.constant 0 : i32
    %c0_i32_1 = arith.constant 0 : i32
    return %c0_i32, %c0_i32_0 : i32, i32
  }
  func.func @transform_9(%arg0: i32) -> (i32, i32, i32) {
    %c0_i32 = arith.constant 0 : i32
    %c0_i32_0 = arith.constant 0 : i32
    %c0_i32_1 = arith.constant 0 : i32
    %c0_i32_2 = arith.constant 0 : i32
    return %c0_i32, %c0_i32_0, %c0_i32_1 : i32, i32, i32
  }
}

</mosaic_0001>

<bundles_post_ra>
// kernel: tpu_custom_call.1
= control target key start
LH: loop header
LB: loop body
LE: loop exit
PB: predicated region body
PF: predicated region fallthrough
CT: control target
= control target key end

     0   :  { %vm77_vm0 = vcmask 130048   ;;  %s3332_s0 = inlined_call_operand.vmem [shape: f32[64,16], index: 0, kind: input, shape index: {}]   ;;  %s3333_s1 = inlined_call_operand.vmem [shape: f32[16,128], index: 1, kind: input, shape index: {}]   ;;  %s3334_s2 = inlined_call_operand.vmem [shape: f32[32,128], index: 2, kind: input, shape index: {}]   ;;  %s3335_s3 = inlined_call_operand.vmem [shape: f32[1,128], index: 3, kind: input, shape index: {}]   ;;  %s3336_s4 = inlined_call_operand.vmem [shape: f32[8,128], index: 4, kind: input, shape index: {}]   ;;  %s3337_s5 = inlined_call_operand.vmem [shape: f32[32,128], index: 5, kind: input, shape index: {}]   ;;  %s3338_s6 = inlined_call_operand.vmem [shape: f32[1,128], index: 6, kind: input, shape index: {}]   ;;  %s3339_s7 = inlined_call_operand.vmem [shape: f32[32,8], index: 7, kind: input, shape index: {}]   ;;  %s3340_s8 = inlined_call_operand.vmem [shape: f32[1,8], index: 8, kind: input, shape index: {}]   ;;  %s3341_s9 = inlined_call_operand.hbm [shape: f32[5,8,8], index: 9, kind: output, shape index: {}]  }
   0x1   :  { %v68_v0 = vld [vmem:[%s3333_s1] sm:$0xff]  ;;  %v69_v1 = vld [vmem:[%s3333_s1 + $0x8] sm:$0xff] }
   0x2   :  { %v64_v2 = vld [vmem:[%s3332_s0 + $0x20] sm:$0xff]  ;;  %v2668_v3 = vpack.c.bf16 %v69_v1, %v68_v0  ;;  %v34_v5 = vld [vmem:[%s3334_s2 + $0x8] sm:$0xff] }
   0x3   :  { %2439 = vmatprep.mubr.msk.f32.mxu1 %vm77_vm0, %v64_v2  ;;  %v33_v4 = vld [vmem:[%s3334_s2] sm:$0xff]  ;;  %v65_v7 = vld [vmem:[%s3332_s0 + $0x28] sm:$0xff] }
   0x4   :  { %v60_v6 = vld [vmem:[%s3332_s0] sm:$0xff]  ;;  %2780 = vmatprep.subr.bf16.mxu1 %v2668_v3  ;;  %2669 = vmatprep.subr.bf16.mxu0 %v2668_v3  ;;  %v2998_v8 = vpack.c.bf16 %v34_v5, %v33_v4  ;;  %v61_v9 = vld [vmem:[%s3332_s0 + $0x8] sm:$0xff] }
   0x5   :  { %2781 = vmatpush3.bf16.msra.mxu1 %v2668_v3  ;;  %2671 = vmatpush3.bf16.msra.mxu0 %v2668_v3 }
   0x6   :  { %14 = vsyncpa [#allocation4], 0  ;;  %v2918_v10 = vmov 0.0|0.0   ;;  %v66_v11 = vld [vmem:[%s3332_s0 + $0x30] sm:$0xff]  ;;  %2433 = vmatprep.mubr.msk.f32.mxu0 %vm77_vm0, %v60_v6  ;;  %v36_v13 = vld [vmem:[%s3334_s2 + $0x18] sm:$0xff]  ;;  %vm2919_vm1 = vmmov 0  }
   0x7   :  { %2672 = vmatprep.subr.bf16.mxu1 %v2918_v10  ;;  %v35_v12 = vld [vmem:[%s3334_s2 + $0x10] sm:$0xff]  ;;  %2684 = vmatprep.subr.bf16.mxu0 %v2918_v10  ;;  %v67_v14 = vld [vmem:[%s3332_s0 + $0x38] sm:$0xff]  ;;  %v2920_v16 = vmov 0.0   ;;  %v3048_v21 = vld [vmem:[%s3335_s3] ss:$0 sm:$0xff]  ;;  %s2921_s12 = smov 64  }
   0x8   :  { %2440 = vmatmul.mubr.msk.f32.vlgmr.msra.gmra.mrb[0].mxu1 %vm77_vm0, %v65_v7  ;;  %2434 = vmatmul.mubr.msk.f32.vlgmr.msra.gmra.mrb[0].mxu0 %vm77_vm0, %v61_v9  ;;  %v3022_v15 = vpack.c.bf16 %v36_v13, %v35_v12  ;;  %s2922_s3 = smov 32   ;;  %vm216_vm2 = vcmask 261120   ;;  %v62_v56 = vld [vmem:[%s3332_s0 + $0x10] sm:$0xff]  ;;  %v63_v57 = vld [vmem:[%s3332_s0 + $0x18] sm:$0xff]  ;;  %vm1104_vm3 = vcmask 64512  }
   0x9   :  { %2674 = vmatpush3.bf16.msra.mxu1 %v2998_v8  ;;  %2442 = vmatprep.mubr.msk.f32.mxu1 %vm77_vm0, %v66_v11 }
   0xa   :  { %2675 = vmatprep.subr.bf16.mxu1 %v2918_v10  ;;  %2686 = vmatpush3.bf16.msra.mxu0 %v2998_v8 }
   0xb   :  { %2687 = vmatprep.subr.bf16.mxu0 %v2918_v10  ;;  %2436 = vmatprep.mubr.msk.f32.mxu0 %vm77_vm0, %v62_v56 }
   0xc   :  { %2443 = vmatmul.mubr.msk.f32.gmra.mrb[2].mxu1 %vm77_vm0, %v67_v14  ;;  %2437 = vmatmul.mubr.msk.f32.gmra.mrb[2].mxu0 %vm77_vm0, %v63_v57 }
   0xd   :  { %2677 = vmatpush3.bf16.msra.mxu1 %v3022_v15  ;;  %2453 = vmatprep.mubr.msk.f32.mxu1 %vm2919_vm1, %v2920_v16 }
   0xe   :  { %2678 = vmatprep.subr.bf16.mxu1 %v2918_v10  ;;  %2689 = vmatpush3.bf16.msra.mxu0 %v3022_v15 }
   0xf   :  { %2696 = vmatprep.subr.bf16.mxu0 %v2918_v10  ;;  %2475 = vmatprep.mubr.msk.f32.mxu0 %vm2919_vm1, %v2920_v16 }
  0x10   :  { %2454 = vmatmul.mubr.f32.vlgmr.msra.gmra.mrb[4].mxu1 %v2920_v16 }
  0x11   :  { %2680 = vmatpush3.bf16.msra.mxu1 %v2998_v8  ;;  %2464 = vmatprep.mubr.msk.f32.mxu1 %vm2919_vm1, %v2920_v16 }
  0x12   :  { %2681 = vmatprep.subr.bf16.mxu1 %v2918_v10 }
  0x15   :  { %2683 = vmatpush3.bf16.msra.mxu1 %v3022_v15 }
  0x16   :  { %2690 = vmatprep.subr.bf16.mxu1 %v2918_v10 }
  0xdb   :  { %v3041_v17 = vpop.f32.mrb[0].mxu1  ;;  %v2435_v18 = vpop.f32.mrb[0].mxu0 }
  0xdc   :  { %v3043_v19 = vpop.f32.mrb[1].mxu1  ;;  %v168_v20 = vpop.f32.mrb[1].mxu0  ;;  %v174_v42 = vadd.f32 %v2435_v18, %v3048_v21 }
  0xdd   :  { %v169_v24 = vadd.f32 %v3048_v21, %v168_v20 }
  0xdf   :  { %v3050_v22 = vpop.f32.mrb[2].mxu1  ;;  %v2438_v61 = vpop.f32.mrb[2].mxu0 }
  0xe0   :  { %v3052_v23 = vpop.f32.mrb[3].mxu1  ;;  %v178_v62 = vpop.f32.mrb[3].mxu0 }
  0xe1   :  { %v179_v0 = vadd.f32 %v3048_v21, %v178_v62  ;;  %v194_v62 = vadd.f32 %v3041_v17, %v3048_v21 }
  0xe3   :  { %v286_v25 = vpop.f32.mrb[4].mxu1 }
  0xe4   :  { %v290_v26 = vadd.f32 %v286_v25, %v169_v24  ;;  %v2455_v27 = vpop.f32.mrb[5].mxu1 }
  0xe5   :  { %v184_v27 = vadd.f32 %v2438_v61, %v3048_v21 }
  0xe6   :  { %2790 = vtanh.f32 %v290_v26  ;;  %v2285_v29 = vmul.f32 -1.442695, %v290_v26 }
  0xe8   :  { %2792 = vpow2.f32 %v2285_v29 }
  0xf0   :  { %v2791_v28 = vpop.eup %2790 }
  0xf1   :  { %300 = vrot.lane.b32.xlu0 %v2791_v28, %s2921_s12 }
  0xf2   :  { %v2793_v30 = vpop.eup %2792 }
  0xf3   :  { %v294_v31 = vadd.f32 1.0, %v2793_v30 }
  0xf5   :  { %2794 = vrcp.f32 %v294_v31 }
  0xff   :  { %v2795_v32 = vpop.eup %2794 }
 0x100   :  { %v298_v35 = vmul.f32 0.0, %v2795_v32 }
 0x163   :  { %v301_v33 = vpop.permute.xlu0 %300 }
 0x164   :  { %v303_v34 = vmul.f32 %v2795_v32, %v301_v33 }
 0x166   :  { %305 = vrot.lane.b32.xlu0 %v303_v34, %s2922_s3 }
 0x1d8   :  { %v306_v36 = vpop.permute.xlu0 %305 }
 0x1d9   :  { %v308_v37 = vadd.f32 %v306_v36, %v298_v35 }
 0x1db   :  { %2796 = vtanh.f32 %v308_v37 }
 0x1e5   :  { %v2797_v38 = vpop.eup %2796 }
 0x1e6   :  { %311 = vrot.lane.b32.xlu1 %v2797_v38, %s2921_s12 }
 0x258   :  { %v312_v39 = vpop.permute.xlu1 %311 }
 0x259   :  { %v314_v40 = vmul.f32 %v2795_v32, %v312_v39 }
 0x25b   :  { %318 = vrot.lane.b32.xlu1 %v314_v40, %s2922_s3 }
 0x2cd   :  { %v319_v41 = vpop.permute.xlu1 %318 }
 0x2ce   :  { %2465 = vmatmul.mubr.msk.f32.vlgmr.msra.gmra.mrb[6].mxu1 %vm216_vm2, %v319_v41 }
 0x2cf   :  { %2692 = vmatpush3.bf16.msra.mxu1 %v2998_v8  ;;  %2486 = vmatprep.mubr.msk.f32.mxu1 %vm2919_vm1, %v2920_v16 }
 0x2d0   :  { %2693 = vmatprep.subr.bf16.mxu1 %v2918_v10 }
 0x2d3   :  { %2695 = vmatpush3.bf16.msra.mxu1 %v3022_v15 }
 0x2d4   :  { %2702 = vmatprep.subr.bf16.mxu1 %v2918_v10 }
 0x3a1   :  { %v388_v43 = vpop.f32.mrb[6].mxu1 }
 0x3a2   :  { %v392_v44 = vadd.f32 %v388_v43, %v174_v42  ;;  %v2466_v45 = vpop.f32.mrb[7].mxu1 }
 0x3a3   :  { %v189_v45 = vadd.f32 %v3048_v21, %v3043_v19 }
 0x3a4   :  { %2798 = vtanh.f32 %v392_v44  ;;  %v2287_v47 = vmul.f32 -1.442695, %v392_v44 }
 0x3a6   :  { %2800 = vpow2.f32 %v2287_v47 }
 0x3ae   :  { %v2799_v46 = vpop.eup %2798 }
 0x3af   :  { %402 = vrot.lane.b32.xlu0 %v2799_v46, %s2921_s12 }
 0x3b0   :  { %v2801_v48 = vpop.eup %2800 }
 0x3b1   :  { %v396_v49 = vadd.f32 1.0, %v2801_v48 }
 0x3b3   :  { %2802 = vrcp.f32 %v396_v49 }
 0x3bd   :  { %v2803_v50 = vpop.eup %2802 }
 0x3be   :  { %v400_v53 = vmul.f32 %v2803_v50, %v308_v37 }
 0x421   :  { %v403_v51 = vpop.permute.xlu0 %402 }
 0x422   :  { %v405_v52 = vmul.f32 %v2803_v50, %v403_v51 }
 0x424   :  { %407 = vrot.lane.b32.xlu1 %v405_v52, %s2922_s3 }
 0x496   :  { %v408_v54 = vpop.permute.xlu1 %407 }
 0x497   :  { %v410_v55 = vadd.f32 %v408_v54, %v400_v53 }
 0x499   :  { %2804 = vtanh.f32 %v410_v55 }
 0x4a3   :  { %v2805_v58 = vpop.eup %2804 }
 0x4a4   :  { %413 = vrot.lane.b32.xlu0 %v2805_v58, %s2921_s12 }
 0x516   :  { %v414_v59 = vpop.permute.xlu0 %413 }
 0x517   :  { %v416_v60 = vmul.f32 %v2803_v50, %v414_v59 }
 0x519   :  { %420 = vrot.lane.b32.xlu1 %v416_v60, %s2922_s3 }
 0x58b   :  { %v421_v63 = vpop.permute.xlu1 %420 }
 0x58c   :  { %2476 = vmatmul.mubr.msk.f32.vlgmr.msra.gmra.mrb[4].mxu0 %vm216_vm2, %v421_v63 }
 0x58d   :  { %2698 = vmatpush3.bf16.msra.mxu0 %v2998_v8  ;;  %2497 = vmatprep.mubr.msk.f32.mxu0 %vm2919_vm1, %v2920_v16 }
 0x58e   :  { %2699 = vmatprep.subr.bf16.mxu0 %v2918_v10 }
 0x591   :  { %2701 = vmatpush3.bf16.msra.mxu0 %v3022_v15 }
 0x592   :  { %2708 = vmatprep.subr.bf16.mxu0 %v2918_v10 }
 0x65f   :  { %v490_v1 = vpop.f32.mrb[4].mxu0 }
 0x660   :  { %v494_v2 = vadd.f32 %v490_v1, %v179_v0  ;;  %v2477_v3 = vpop.f32.mrb[5].mxu0 }
 0x662   :  { %2806 = vtanh.f32 %v494_v2  ;;  %v2289_v5 = vmul.f32 -1.442695, %v494_v2 }
 0x664   :  { %2808 = vpow2.f32 %v2289_v5 }
 0x66c   :  { %v2807_v4 = vpop.eup %2806 }
 0x66d   :  { %504 = vrot.lane.b32.xlu0 %v2807_v4, %s2921_s12 }
 0x66e   :  { %v2809_v6 = vpop.eup %2808 }
 0x66f   :  { %v498_v7 = vadd.f32 1.0, %v2809_v6 }
 0x671   :  { %2810 = vrcp.f32 %v498_v7 }
 0x67b   :  { %v2811_v9 = vpop.eup %2810 }
 0x67c   :  { %v502_v13 = vmul.f32 %v2811_v9, %v410_v55 }
 0x6df   :  { %v505_v11 = vpop.permute.xlu0 %504 }
 0x6e0   :  { %v507_v12 = vmul.f32 %v2811_v9, %v505_v11 }
 0x6e2   :  { %509 = vrot.lane.b32.xlu1 %v507_v12, %s2922_s3 }
 0x754   :  { %v510_v14 = vpop.permute.xlu1 %509 }
 0x755   :  { %v512_v18 = vadd.f32 %v510_v14, %v502_v13 }
 0x757   :  { %2812 = vtanh.f32 %v512_v18 }
 0x761   :  { %v2813_v20 = vpop.eup %2812 }
 0x762   :  { %515 = vrot.lane.b32.xlu0 %v2813_v20, %s2921_s12 }
 0x7d4   :  { %v516_v24 = vpop.permute.xlu0 %515 }
 0x7d5   :  { %v518_v25 = vmul.f32 %v2811_v9, %v516_v24 }
 0x7d7   :  { %522 = vrot.lane.b32.xlu1 %v518_v25, %s2922_s3 }
 0x849   :  { %v523_v26 = vpop.permute.xlu1 %522 }
 0x84a   :  { %2487 = vmatmul.mubr.msk.f32.vlgmr.msra.gmra.mrb[8].mxu1 %vm216_vm2, %v523_v26 }
 0x84b   :  { %2704 = vmatpush3.bf16.msra.mxu1 %v2998_v8  ;;  %2508 = vmatprep.mubr.msk.f32.mxu1 %vm2919_vm1, %v2920_v16 }
 0x84c   :  { %2705 = vmatprep.subr.bf16.mxu1 %v2918_v10 }
 0x84f   :  { %2707 = vmatpush3.bf16.msra.mxu1 %v3022_v15 }
 0x850   :  { %2714 = vmatprep.subr.bf16.mxu1 %v2918_v10 }
 0x91d   :  { %v592_v28 = vpop.f32.mrb[8].mxu1 }
 0x91e   :  { %v596_v29 = vadd.f32 %v592_v28, %v184_v27  ;;  %v2488_v30 = vpop.f32.mrb[9].mxu1 }
 0x920   :  { %2814 = vtanh.f32 %v596_v29  ;;  %v2291_v32 = vmul.f32 -1.442695, %v596_v29 }
 0x922   :  { %2816 = vpow2.f32 %v2291_v32 }
 0x92a   :  { %v2815_v31 = vpop.eup %2814 }
 0x92b   :  { %606 = vrot.lane.b32.xlu0 %v2815_v31, %s2921_s12 }
 0x92c   :  { %v2817_v33 = vpop.eup %2816 }
 0x92d   :  { %v600_v34 = vadd.f32 1.0, %v2817_v33 }
 0x92f   :  { %2818 = vrcp.f32 %v600_v34 }
 0x939   :  { %v2819_v35 = vpop.eup %2818 }
 0x93a   :  { %v604_v38 = vmul.f32 %v2819_v35, %v512_v18  ;;  %v199_v18 = vadd.f32 %v3048_v21, %v3052_v23 }
 0x99d   :  { %v607_v36 = vpop.permute.xlu0 %606 }
 0x99e   :  { %v609_v37 = vmul.f32 %v2819_v35, %v607_v36 }
 0x9a0   :  { %611 = vrot.lane.b32.xlu1 %v609_v37, %s2922_s3 }
 0xa12   :  { %v612_v39 = vpop.permute.xlu1 %611 }
 0xa13   :  { %v614_v40 = vadd.f32 %v612_v39, %v604_v38  ;;  %v204_v39 = vadd.f32 %v3050_v22, %v3048_v21  ;;  %v38_v22 = vld [vmem:[%s3337_s5] sm:$0xff] }
 0xa15   :  { %2820 = vtanh.f32 %v614_v40 }
 0xa1f   :  { %v2821_v41 = vpop.eup %2820 }
 0xa20   :  { %617 = vrot.lane.b32.xlu0 %v2821_v41, %s2921_s12 }
 0xa92   :  { %v618_v42 = vpop.permute.xlu0 %617 }
 0xa93   :  { %v620_v43 = vmul.f32 %v2819_v35, %v618_v42 }
 0xa95   :  { %624 = vrot.lane.b32.xlu1 %v620_v43, %s2922_s3 }
 0xb07   :  { %v625_v44 = vpop.permute.xlu1 %624 }
 0xb08   :  { %2498 = vmatmul.mubr.msk.f32.vlgmr.msra.gmra.mrb[6].mxu0 %vm216_vm2, %v625_v44 }
 0xb09   :  { %2710 = vmatpush3.bf16.msra.mxu0 %v2998_v8  ;;  %2519 = vmatprep.mubr.msk.f32.mxu0 %vm2919_vm1, %v2920_v16 }
 0xb0a   :  { %2711 = vmatprep.subr.bf16.mxu0 %v2918_v10 }
 0xb0d   :  { %2713 = vmatpush3.bf16.msra.mxu0 %v3022_v15 }
 0xb0e   :  { %2720 = vmatprep.subr.bf16.mxu0 %v2918_v10 }
 0xbdb   :  { %v694_v46 = vpop.f32.mrb[6].mxu0 }
 0xbdc   :  { %v698_v47 = vadd.f32 %v694_v46, %v189_v45  ;;  %v2499_v48 = vpop.f32.mrb[7].mxu0 }
 0xbde   :  { %2822 = vtanh.f32 %v698_v47  ;;  %v2293_v50 = vmul.f32 -1.442695, %v698_v47 }
 0xbe0   :  { %2824 = vpow2.f32 %v2293_v50 }
 0xbe8   :  { %v2823_v49 = vpop.eup %2822 }
 0xbe9   :  { %708 = vrot.lane.b32.xlu0 %v2823_v49, %s2921_s12 }
 0xbea   :  { %v2825_v51 = vpop.eup %2824 }
 0xbeb   :  { %v702_v52 = vadd.f32 1.0, %v2825_v51 }
 0xbed   :  { %2826 = vrcp.f32 %v702_v52  ;;  %v39_v52 = vld [vmem:[%s3337_s5 + $0x8] sm:$0xff] }
 0xbf7   :  { %v2827_v53 = vpop.eup %2826 }
 0xbf8   :  { %v706_v56 = vmul.f32 %v2827_v53, %v614_v40 }
 0xc5b   :  { %v709_v54 = vpop.permute.xlu0 %708 }
 0xc5c   :  { %v711_v55 = vmul.f32 %v2827_v53, %v709_v54  ;;  %v3156_v54 = vpack.c.bf16 %v39_v52, %v38_v22 }
 0xc5e   :  { %713 = vrot.lane.b32.xlu1 %v711_v55, %s2922_s3  ;;  %v41_v55 = vld [vmem:[%s3337_s5 + $0x18] sm:$0xff] }
 0xcd0   :  { %v714_v57 = vpop.permute.xlu1 %713 }
 0xcd1   :  { %v716_v19 = vadd.f32 %v714_v57, %v706_v56  ;;  %v3164_v56 = vld [vmem:[%s3336_s4] sm:$0xff] }
 0xcd3   :  { %2828 = vtanh.f32 %v716_v19 }
 0xcdd   :  { %v2829_v58 = vpop.eup %2828 }
 0xcde   :  { %719 = vrot.lane.b32.xlu0 %v2829_v58, %s2921_s12 }
 0xd50   :  { %v720_v59 = vpop.permute.xlu0 %719 }
 0xd51   :  { %v722_v60 = vmul.f32 %v2827_v53, %v720_v59  ;;  %v40_v53 = vld [vmem:[%s3337_s5 + $0x10] sm:$0xff] }
 0xd52   :  { %v3168_v57 = vpack.c.bf16 %v41_v55, %v40_v53 }
 0xd53   :  { %726 = vrot.lane.b32.xlu1 %v722_v60, %s2922_s3 }
 0xdc5   :  { %v727_v61 = vpop.permute.xlu1 %726 }
 0xdc6   :  { %2509 = vmatmul.mubr.msk.f32.vlgmr.msra.gmra.mrb[10].mxu1 %vm216_vm2, %v727_v61 }
 0xdc7   :  { %2716 = vmatpush3.bf16.msra.mxu1 %v2998_v8  ;;  %2530 = vmatprep.mubr.msk.f32.mxu1 %vm2919_vm1, %v2920_v16 }
 0xdc8   :  { %2717 = vmatprep.subr.bf16.mxu1 %v2918_v10 }
 0xdcb   :  { %2719 = vmatpush3.bf16.msra.mxu1 %v3022_v15 }
 0xdcc   :  { %2544 = vmatprep.subr.mxu1 %v2920_v16 }
 0xe99   :  { %v796_v63 = vpop.f32.mrb[10].mxu1 }
 0xe9a   :  { %v800_v0 = vadd.f32 %v796_v63, %v194_v62  ;;  %v2510_v1 = vpop.f32.mrb[11].mxu1 }
 0xe9c   :  { %2830 = vtanh.f32 %v800_v0  ;;  %v2295_v8 = vmul.f32 -1.442695, %v800_v0  ;;  %v3189_v0 = vld [vmem:[%s3338_s6] ss:$0 sm:$0xff] }
 0xe9e   :  { %2832 = vpow2.f32 %v2295_v8 }
 0xea6   :  { %v2831_v2 = vpop.eup %2830 }
 0xea7   :  { %810 = vrot.lane.b32.xlu0 %v2831_v2, %s2921_s12 }
 0xea8   :  { %v2833_v3 = vpop.eup %2832 }
 0xea9   :  { %v804_v4 = vadd.f32 1.0, %v2833_v3 }
 0xeab   :  { %2834 = vrcp.f32 %v804_v4 }
 0xeb5   :  { %v2835_v5 = vpop.eup %2834 }
 0xeb6   :  { %v808_v7 = vmul.f32 %v2835_v5, %v716_v19 }
 0xf19   :  { %v811_v6 = vpop.permute.xlu0 %810 }
 0xf1a   :  { %v813_v15 = vmul.f32 %v2835_v5, %v811_v6 }
 0xf1c   :  { %815 = vrot.lane.b32.xlu1 %v813_v15, %s2922_s3 }
 0xf8e   :  { %v816_v9 = vpop.permute.xlu1 %815 }
 0xf8f   :  { %v818_v17 = vadd.f32 %v816_v9, %v808_v7 }
 0xf91   :  { %2836 = vtanh.f32 %v818_v17 }
 0xf9b   :  { %v2837_v11 = vpop.eup %2836 }
 0xf9c   :  { %821 = vrot.lane.b32.xlu0 %v2837_v11, %s2921_s12 }
0x100e   :  { %v822_v12 = vpop.permute.xlu0 %821 }
0x100f   :  { %v824_v13 = vmul.f32 %v2835_v5, %v822_v12 }
0x1011   :  { %828 = vrot.lane.b32.xlu1 %v824_v13, %s2922_s3  ;;  %v42_v13 = vld [vmem:[%s3339_s7] sm:$0xff] }
0x1083   :  { %v829_v14 = vpop.permute.xlu1 %828 }
0x1084   :  { %2520 = vmatmul.mubr.msk.f32.vlgmr.msra.gmra.mrb[8].mxu0 %vm216_vm2, %v829_v14  ;;  %v43_v14 = vld [vmem:[%s3339_s7 + $0x8] sm:$0xff] }
0x1085   :  { %2541 = vmatprep.mubr.msk.f32.mxu0 %vm2919_vm1, %v2920_v16  ;;  %2722 = vmatpush3.bf16.msra.mxu0 %v3156_v54 }
0x1086   :  { %2723 = vmatprep.subr.bf16.mxu0 %v2918_v10 }
0x1089   :  { %2725 = vmatpush3.bf16.msra.mxu0 %v3168_v57 }
0x108a   :  { %2726 = vmatprep.subr.bf16.mxu0 %v2918_v10 }
0x1157   :  { %v898_v20 = vpop.f32.mrb[8].mxu0 }
0x1158   :  { %v902_v24 = vadd.f32 %v898_v20, %v199_v18  ;;  %v2521_v25 = vpop.f32.mrb[9].mxu0  ;;  %v44_v18 = vld [vmem:[%s3339_s7 + $0x10] sm:$0xff]  ;;  %v3203_v20 = vpack.c.bf16 %v43_v14, %v42_v13 }
0x115a   :  { %2838 = vtanh.f32 %v902_v24  ;;  %v2297_v27 = vmul.f32 -1.442695, %v902_v24  ;;  %v45_v24 = vld [vmem:[%s3339_s7 + $0x18] sm:$0xff] }
0x115b   :  { %v3209_v25 = vpack.c.bf16 %v45_v24, %v44_v18 }
0x115c   :  { %2840 = vpow2.f32 %v2297_v27 }
0x1164   :  { %v2839_v26 = vpop.eup %2838 }
0x1165   :  { %912 = vrot.lane.b32.xlu0 %v2839_v26, %s2921_s12 }
0x1166   :  { %v2841_v28 = vpop.eup %2840 }
0x1167   :  { %v906_v29 = vadd.f32 1.0, %v2841_v28 }
0x1169   :  { %2842 = vrcp.f32 %v906_v29 }
0x1173   :  { %v2843_v30 = vpop.eup %2842 }
0x1174   :  { %v910_v33 = vmul.f32 %v2843_v30, %v818_v17 }
0x11d7   :  { %v913_v31 = vpop.permute.xlu0 %912 }
0x11d8   :  { %v915_v32 = vmul.f32 %v2843_v30, %v913_v31 }
0x11da   :  { %917 = vrot.lane.b32.xlu1 %v915_v32, %s2922_s3 }
0x124c   :  { %v918_v34 = vpop.permute.xlu1 %917 }
0x124d   :  { %v920_v23 = vadd.f32 %v918_v34, %v910_v33 }
0x124f   :  { %2844 = vtanh.f32 %v920_v23 }
0x1259   :  { %v2845_v35 = vpop.eup %2844 }
0x125a   :  { %923 = vrot.lane.b32.xlu0 %v2845_v35, %s2921_s12 }
0x12cc   :  { %v924_v36 = vpop.permute.xlu0 %923 }
0x12cd   :  { %v926_v37 = vmul.f32 %v2843_v30, %v924_v36  ;;  %v3231_v30 = vld [vmem:[%s3340_s8] ss:$0 sm:$0xff]  ;;  %s2923_s8 = smov [#allocation3]  }
0x12ce   :  { %s2263_s11 = sshll.u32 %s2923_s8, 4  ;;  %s2264_s11 = int_to_ptr.vmem [resolvable:$true] %s2263_s11 }
0x12cf   :  { %930 = vrot.lane.b32.xlu1 %v926_v37, %s2922_s3  ;;  %s2894_s13 = scalar_lea.vmem %s2264_s11, 640  ;;  %p2899_p1 = scmp.lt.s32.totalorder %s2264_s11, %s2264_s11 }
0x12d0   :  { %p2895_p0 = scmp.ne.s32.totalorder %s2264_s11, %s2894_s13  ;;  %p2900_p2 = scmp.lt.s32.totalorder %s2894_s13, %s2894_s13 }
0x12d2   :  { %p2901_p3 = por %p2900_p2, %p2899_p1 }
0x12d4   :  { %p2902_p4 = pnand %p2901_p3, %p2895_p0 }
0x1341   :  { %v931_v38 = vpop.permute.xlu1 %930 }
0x1342   :  { %2531 = vmatmul.mubr.msk.f32.vlgmr.msra.gmra.mrb[12].mxu1 %vm216_vm2, %v931_v38 }
0x1343   :  { %2546 = vmatprep.mubr.msk.f32.mxu1 %vm2919_vm1, %v2920_v16  ;;  %2545 = vmatpush3.msra.mxu1 %v3164_v56 }
0x1344   :  { %2732 = vmatprep.subr.bf16.mxu1 %v2918_v10 }
0x1346   :  { %2547 = vmatmul.mubr.f32.vlgmr.msra.gmra.mrb[14].mxu1 %v2920_v16 }
0x1347   :  { %2734 = vmatpush3.bf16.msra.mxu1 %v3156_v54  ;;  %2568 = vmatprep.mubr.msk.f32.mxu1 %vm2919_vm1, %v2920_v16 }
0x1348   :  { %2735 = vmatprep.subr.bf16.mxu1 %v2918_v10 }
0x134b   :  { %2737 = vmatpush3.bf16.msra.mxu1 %v3168_v57 }
0x134c   :  { %2738 = vmatprep.subr.bf16.mxu1 %v2918_v10 }
0x1415   :  { %v1000_v40 = vpop.f32.mrb[12].mxu1 }
0x1416   :  { %v1004_v41 = vadd.f32 %v1000_v40, %v204_v39  ;;  %v2532_v42 = vpop.f32.mrb[13].mxu1 }
0x1418   :  { %2846 = vtanh.f32 %v1004_v41  ;;  %v2299_v44 = vmul.f32 -1.442695, %v1004_v41 }
0x1419   :  { %v1173_v61 = vpop.f32.mrb[14].mxu1 }
0x141a   :  { %2848 = vpow2.f32 %v2299_v44  ;;  %v2548_v62 = vpop.f32.mrb[15].mxu1 }
0x1422   :  { %v2847_v43 = vpop.eup %2846 }
0x1423   :  { %1014 = vrot.lane.b32.xlu0 %v2847_v43, %s2921_s12 }
0x1424   :  { %v2849_v45 = vpop.eup %2848 }
0x1425   :  { %v1008_v46 = vadd.f32 1.0, %v2849_v45 }
0x1427   :  { %2850 = vrcp.f32 %v1008_v46 }
0x1431   :  { %v2851_v47 = vpop.eup %2850 }
0x1432   :  { %v1012_v50 = vmul.f32 %v2851_v47, %v920_v23 }
0x1495   :  { %v1015_v48 = vpop.permute.xlu0 %1014 }
0x1496   :  { %v1017_v49 = vmul.f32 %v2851_v47, %v1015_v48 }
0x1498   :  { %1019 = vrot.lane.b32.xlu1 %v1017_v49, %s2922_s3 }
0x150a   :  { %v1020_v51 = vpop.permute.xlu1 %1019 }
0x150b   :  { %v1022_v21 = vadd.f32 %v1020_v51, %v1012_v50 }
0x150d   :  { %2852 = vtanh.f32 %v1022_v21 }
0x1517   :  { %v2853_v19 = vpop.eup %2852 }
0x1518   :  { %1025 = vrot.lane.b32.xlu0 %v2853_v19, %s2921_s12 }
0x158a   :  { %v1026_v58 = vpop.permute.xlu0 %1025 }
0x158b   :  { %v1028_v59 = vmul.f32 %v2851_v47, %v1026_v58 }
0x158d   :  { %1030 = vrot.lane.b32.xlu1 %v1028_v59, %s2922_s3 }
0x15ff   :  { %v1031_v60 = vpop.permute.xlu1 %1030 }
0x1600   :  { %2542 = vmatmul.mubr.msk.f32.vlgmr.msra.gmra.mrb[10].mxu0 %vm216_vm2, %v1031_v60 }
0x1601   :  { %2557 = vmatprep.mubr.msk.f32.mxu0 %vm2919_vm1, %v2920_v16  ;;  %2728 = vmatpush3.bf16.msra.mxu0 %v3203_v20 }
0x1602   :  { %2729 = vmatprep.subr.bf16.mxu0 %v2918_v10 }
0x1605   :  { %2731 = vmatpush3.bf16.msra.mxu0 %v3209_v25 }
0x1606   :  { %2571 = vmatprep.subr.mxu0 %v2920_v16 }
0x16d3   :  { %v1100_v63 = vpop.f32.mrb[10].mxu0 }
0x16d4   :  { %v1174_v1 = vadd.f32 %v1173_v61, %v1100_v63  ;;  %v2543_v2 = vpop.f32.mrb[11].mxu0 }
0x16d6   :  { %v1177_v8 = vadd.f32 %v3189_v0, %v1174_v1 }
0x16d8   :  { %2854 = vtanh.f32 %v1177_v8  ;;  %v2301_v4 = vmul.f32 -1.442695, %v1177_v8 }
0x16da   :  { %2856 = vpow2.f32 %v2301_v4 }
0x16e2   :  { %v2855_v3 = vpop.eup %2854 }
0x16e3   :  { %1187 = vrot.lane.b32.xlu0 %v2855_v3, %s2921_s12 }
0x16e4   :  { %v2857_v5 = vpop.eup %2856 }
0x16e5   :  { %v1181_v6 = vadd.f32 1.0, %v2857_v5 }
0x16e7   :  { %2858 = vrcp.f32 %v1181_v6 }
0x16f1   :  { %v2859_v15 = vpop.eup %2858 }
0x16f2   :  { %v1185_v17 = vmul.f32 %v2859_v15, %v1022_v21 }
0x1755   :  { %v1188_v7 = vpop.permute.xlu0 %1187 }
0x1756   :  { %v1190_v9 = vmul.f32 %v2859_v15, %v1188_v7 }
0x1758   :  { %1192 = vrot.lane.b32.xlu1 %v1190_v9, %s2922_s3 }
0x17ca   :  { %v1193_v11 = vpop.permute.xlu1 %1192 }
0x17cb   :  { %v1195_v12 = vadd.f32 %v1193_v11, %v1185_v17 }
0x17cd   :  { %2860 = vtanh.f32 %v1195_v12 }
0x17d7   :  { %v2861_v26 = vpop.eup %2860 }
0x17d8   :  { %1198 = vrot.lane.b32.xlu0 %v2861_v26, %s2921_s12 }
0x184a   :  { %v1199_v27 = vpop.permute.xlu0 %1198 }
0x184b   :  { %v1201_v28 = vmul.f32 %v2859_v15, %v1199_v27 }
0x184d   :  { %1203 = vrot.lane.b32.xlu1 %v1201_v28, %s2922_s3 }
0x18bf   :  { %v1204_v29 = vpop.permute.xlu1 %1203 }
0x18c0   :  { %2558 = vmatmul.mubr.msk.f32.vlgmr.msra.gmra.mrb[12].mxu0 %vm216_vm2, %v1204_v29  ;;  %2569 = vmatmul.mubr.msk.f32.vlgmr.msra.gmra.mrb[16].mxu1 %vm216_vm2, %v1204_v29 }
0x18c1   :  { %2572 = vmatpush3.msra.mxu0 %v3164_v56  ;;  %2573 = vmatprep.mubr.msk.f32.mxu0 %vm2919_vm1, %v2920_v16 }
0x18c2   :  { %2744 = vmatprep.subr.bf16.mxu0 %v2918_v10  ;;  %2740 = vmatpush3.bf16.msra.mxu1 %v3203_v20 }
0x18c3   :  { %2741 = vmatprep.subr.bf16.mxu1 %v2918_v10  ;;  %2584 = vmatprep.mubr.msk.f32.mxu1 %vm2919_vm1, %v2920_v16 }
0x18c6   :  { %2743 = vmatpush3.bf16.msra.mxu1 %v3209_v25 }
0x18c7   :  { %2598 = vmatprep.subr.mxu1 %v2920_v16 }
0x1993   :  { %v1273_v31 = vpop.f32.mrb[12].mxu0  ;;  %v1344_v32 = vpop.f32.mrb[16].mxu1 }
0x1994   :  { %v1274_v33 = vadd.f32 %v3231_v30, %v1273_v31  ;;  %v2559_v34 = vpop.f32.mrb[13].mxu0  ;;  %v2570_v23 = vpop.f32.mrb[17].mxu1 }
0x1996   :  { %1277 = vst.msk [vmem:[#allocation3] sm:$0xff] %vm1104_vm3, %v1274_v33  ;;  %2574 = vmatmul.mubr.msk.f32.vlgmr.msra.gmra.mrb[14].mxu0 %vm1104_vm3, %v1274_v33 }
0x1997   :  { %2746 = vmatpush3.bf16.msra.mxu0 %v3156_v54  ;;  %2595 = vmatprep.mubr.msk.f32.mxu0 %vm2919_vm1, %v2920_v16 }
0x1998   :  { %2747 = vmatprep.subr.bf16.mxu0 %v2918_v10 }
0x199b   :  { %2749 = vmatpush3.bf16.msra.mxu0 %v3168_v57 }
0x199c   :  { %2750 = vmatprep.subr.bf16.mxu0 %v2918_v10 }
0x1a69   :  { %v1417_v35 = vpop.f32.mrb[14].mxu0 }
0x1a6a   :  { %v1418_v36 = vadd.f32 %v1417_v35, %v1344_v32  ;;  %v2575_v37 = vpop.f32.mrb[15].mxu0 }
0x1a6c   :  { %v1421_v38 = vadd.f32 %v3189_v0, %v1418_v36 }
0x1a6e   :  { %2862 = vtanh.f32 %v1421_v38  ;;  %v2305_v40 = vmul.f32 -1.442695, %v1421_v38 }
0x1a70   :  { %2864 = vpow2.f32 %v2305_v40 }
0x1a78   :  { %v2863_v39 = vpop.eup %2862 }
0x1a79   :  { %1431 = vrot.lane.b32.xlu0 %v2863_v39, %s2921_s12 }
0x1a7a   :  { %v2865_v41 = vpop.eup %2864 }
0x1a7b   :  { %v1425_v42 = vadd.f32 1.0, %v2865_v41 }
0x1a7d   :  { %2866 = vrcp.f32 %v1425_v42 }
0x1a87   :  { %v2867_v43 = vpop.eup %2866 }
0x1a88   :  { %v1429_v46 = vmul.f32 %v2867_v43, %v1195_v12 }
0x1aeb   :  { %v1432_v44 = vpop.permute.xlu0 %1431 }
0x1aec   :  { %v1434_v45 = vmul.f32 %v2867_v43, %v1432_v44 }
0x1aee   :  { %1436 = vrot.lane.b32.xlu1 %v1434_v45, %s2922_s3 }
0x1b60   :  { %v1437_v47 = vpop.permute.xlu1 %1436 }
0x1b61   :  { %v1439_v48 = vadd.f32 %v1437_v47, %v1429_v46 }
0x1b63   :  { %2868 = vtanh.f32 %v1439_v48 }
0x1b6d   :  { %v2869_v49 = vpop.eup %2868 }
0x1b6e   :  { %1442 = vrot.lane.b32.xlu0 %v2869_v49, %s2921_s12 }
0x1be0   :  { %v1443_v50 = vpop.permute.xlu0 %1442 }
0x1be1   :  { %v1445_v51 = vmul.f32 %v2867_v43, %v1443_v50 }
0x1be3   :  { %1447 = vrot.lane.b32.xlu1 %v1445_v51, %s2922_s3 }
0x1c55   :  { %v1448_v21 = vpop.permute.xlu1 %1447 }
0x1c56   :  { %2585 = vmatmul.mubr.msk.f32.vlgmr.msra.gmra.mrb[18].mxu1 %vm216_vm2, %v1448_v21  ;;  %2596 = vmatmul.mubr.msk.f32.vlgmr.msra.gmra.mrb[16].mxu0 %vm216_vm2, %v1448_v21 }
0x1c57   :  { %2599 = vmatpush3.msra.mxu1 %v3164_v56  ;;  %2600 = vmatprep.mubr.msk.f32.mxu1 %vm2919_vm1, %v2920_v16 }
0x1c58   :  { %2756 = vmatprep.subr.bf16.mxu1 %v2918_v10  ;;  %2752 = vmatpush3.bf16.msra.mxu0 %v3203_v20 }
0x1c59   :  { %2753 = vmatprep.subr.bf16.mxu0 %v2918_v10  ;;  %2611 = vmatprep.mubr.msk.f32.mxu0 %vm2919_vm1, %v2920_v16 }
0x1c5c   :  { %2755 = vmatpush3.bf16.msra.mxu0 %v3209_v25 }
0x1c5d   :  { %2625 = vmatprep.subr.mxu0 %v2920_v16 }
0x1d29   :  { %v1517_v22 = vpop.f32.mrb[18].mxu1  ;;  %v1589_v52 = vpop.f32.mrb[16].mxu0 }
0x1d2a   :  { %v1518_v53 = vadd.f32 %v3231_v30, %v1517_v22  ;;  %v2586_v55 = vpop.f32.mrb[19].mxu1  ;;  %v2597_v19 = vpop.f32.mrb[17].mxu0 }
0x1d2c   :  { %1522 = vst.msk [vmem:[#allocation3 + $0x8] sm:$0xff] %vm1104_vm3, %v1518_v53  ;;  %2601 = vmatmul.mubr.msk.f32.vlgmr.msra.gmra.mrb[20].mxu1 %vm1104_vm3, %v1518_v53 }
0x1d2d   :  { %2758 = vmatpush3.bf16.msra.mxu1 %v3156_v54  ;;  %2622 = vmatprep.mubr.msk.f32.mxu1 %vm2919_vm1, %v2920_v16 }
0x1d2e   :  { %2759 = vmatprep.subr.bf16.mxu1 %v2918_v10 }
0x1d31   :  { %2761 = vmatpush3.bf16.msra.mxu1 %v3168_v57 }
0x1d32   :  { %2762 = vmatprep.subr.bf16.mxu1 %v2918_v10 }
0x1dff   :  { %v1662_v58 = vpop.f32.mrb[20].mxu1 }
0x1e00   :  { %v1663_v59 = vadd.f32 %v1662_v58, %v1589_v52  ;;  %v2602_v60 = vpop.f32.mrb[21].mxu1 }
0x1e02   :  { %v1666_v61 = vadd.f32 %v3189_v0, %v1663_v59 }
0x1e04   :  { %2870 = vtanh.f32 %v1666_v61  ;;  %v2309_v63 = vmul.f32 -1.442695, %v1666_v61 }
0x1e06   :  { %2872 = vpow2.f32 %v2309_v63 }
0x1e0e   :  { %v2871_v62 = vpop.eup %2870 }
0x1e0f   :  { %1676 = vrot.lane.b32.xlu0 %v2871_v62, %s2921_s12 }
0x1e10   :  { %v2873_v1 = vpop.eup %2872 }
0x1e11   :  { %v1670_v2 = vadd.f32 1.0, %v2873_v1 }
0x1e13   :  { %2874 = vrcp.f32 %v1670_v2 }
0x1e1d   :  { %v2875_v8 = vpop.eup %2874 }
0x1e1e   :  { %v1674_v5 = vmul.f32 %v2875_v8, %v1439_v48 }
0x1e81   :  { %v1677_v3 = vpop.permute.xlu0 %1676 }
0x1e82   :  { %v1679_v4 = vmul.f32 %v2875_v8, %v1677_v3 }
0x1e84   :  { %1681 = vrot.lane.b32.xlu1 %v1679_v4, %s2922_s3 }
0x1ef6   :  { %v1682_v6 = vpop.permute.xlu1 %1681 }
0x1ef7   :  { %v1684_v15 = vadd.f32 %v1682_v6, %v1674_v5 }
0x1ef9   :  { %2876 = vtanh.f32 %v1684_v15 }
0x1f03   :  { %v2877_v7 = vpop.eup %2876 }
0x1f04   :  { %1687 = vrot.lane.b32.xlu0 %v2877_v7, %s2921_s12 }
0x1f76   :  { %v1688_v9 = vpop.permute.xlu0 %1687 }
0x1f77   :  { %v1690_v17 = vmul.f32 %v2875_v8, %v1688_v9 }
0x1f79   :  { %1692 = vrot.lane.b32.xlu1 %v1690_v17, %s2922_s3 }
0x1feb   :  { %v1693_v11 = vpop.permute.xlu1 %1692 }
0x1fec   :  { %2612 = vmatmul.mubr.msk.f32.vlgmr.msra.gmra.mrb[18].mxu0 %vm216_vm2, %v1693_v11  ;;  %2623 = vmatmul.mubr.msk.f32.vlgmr.msra.gmra.mrb[22].mxu1 %vm216_vm2, %v1693_v11 }
0x1fed   :  { %2626 = vmatpush3.msra.mxu0 %v3164_v56  ;;  %2627 = vmatprep.mubr.msk.f32.mxu0 %vm2919_vm1, %v2920_v16 }
0x1fee   :  { %2768 = vmatprep.subr.bf16.mxu0 %v2918_v10  ;;  %2764 = vmatpush3.bf16.msra.mxu1 %v3203_v20 }
0x1fef   :  { %2765 = vmatprep.subr.bf16.mxu1 %v2918_v10  ;;  %2638 = vmatprep.mubr.msk.f32.mxu1 %vm2919_vm1, %v2920_v16 }
0x1ff2   :  { %2767 = vmatpush3.bf16.msra.mxu1 %v3209_v25 }
0x1ff3   :  { %2652 = vmatprep.subr.mxu1 %v2920_v16 }
0x20bf   :  { %v1762_v12 = vpop.f32.mrb[18].mxu0  ;;  %v1834_v13 = vpop.f32.mrb[22].mxu1 }
0x20c0   :  { %v1763_v14 = vadd.f32 %v3231_v30, %v1762_v12  ;;  %v2613_v18 = vpop.f32.mrb[19].mxu0  ;;  %v2624_v24 = vpop.f32.mrb[23].mxu1 }
0x20c2   :  { %1767 = vst.msk [vmem:[#allocation3 + $0x10] sm:$0xff] %vm1104_vm3, %v1763_v14  ;;  %2628 = vmatmul.mubr.msk.f32.vlgmr.msra.gmra.mrb[20].mxu0 %vm1104_vm3, %v1763_v14 }
0x20c3   :  { %2770 = vmatpush3.bf16.msra.mxu0 %v3156_v54  ;;  %2649 = vmatprep.mubr.msk.f32.mxu0 %vm2919_vm1, %v2920_v16 }
0x20c4   :  { %2771 = vmatprep.subr.bf16.mxu0 %v2918_v10 }
0x20c7   :  { %2773 = vmatpush3.bf16.msra.mxu0 %v3168_v57 }
0x20c8   :  { %2774 = vmatprep.subr.bf16.mxu0 %v2918_v10 }
0x2195   :  { %v1907_v26 = vpop.f32.mrb[20].mxu0 }
0x2196   :  { %v1908_v27 = vadd.f32 %v1907_v26, %v1834_v13  ;;  %v2629_v28 = vpop.f32.mrb[21].mxu0 }
0x2198   :  { %v1911_v29 = vadd.f32 %v3189_v0, %v1908_v27 }
0x219a   :  { %2878 = vtanh.f32 %v1911_v29  ;;  %v2313_v32 = vmul.f32 -1.442695, %v1911_v29 }
0x219c   :  { %2880 = vpow2.f32 %v2313_v32 }
0x21a4   :  { %v2879_v31 = vpop.eup %2878 }
0x21a5   :  { %1921 = vrot.lane.b32.xlu0 %v2879_v31, %s2921_s12 }
0x21a6   :  { %v2881_v54 = vpop.eup %2880 }
0x21a7   :  { %v1915_v33 = vadd.f32 1.0, %v2881_v54 }
0x21a9   :  { %2882 = vrcp.f32 %v1915_v33 }
0x21b3   :  { %v2883_v34 = vpop.eup %2882 }
0x21b4   :  { %v1919_v57 = vmul.f32 %v2883_v34, %v1684_v15 }
0x2217   :  { %v1922_v23 = vpop.permute.xlu0 %1921 }
0x2218   :  { %v1924_v35 = vmul.f32 %v2883_v34, %v1922_v23 }
0x221a   :  { %1926 = vrot.lane.b32.xlu1 %v1924_v35, %s2922_s3 }
0x228c   :  { %v1927_v36 = vpop.permute.xlu1 %1926 }
0x228d   :  { %v1929_v37 = vadd.f32 %v1927_v36, %v1919_v57 }
0x228f   :  { %2884 = vtanh.f32 %v1929_v37 }
0x2299   :  { %v2885_v38 = vpop.eup %2884 }
0x229a   :  { %1932 = vrot.lane.b32.xlu0 %v2885_v38, %s2921_s12 }
0x230c   :  { %v1933_v39 = vpop.permute.xlu0 %1932 }
0x230d   :  { %v1935_v40 = vmul.f32 %v2883_v34, %v1933_v39 }
0x230f   :  { %1937 = vrot.lane.b32.xlu1 %v1935_v40, %s2922_s3 }
0x2381   :  { %v1938_v41 = vpop.permute.xlu1 %1937 }
0x2382   :  { %2639 = vmatmul.mubr.msk.f32.vlgmr.msra.gmra.mrb[24].mxu1 %vm216_vm2, %v1938_v41  ;;  %2650 = vmatmul.mubr.msk.f32.vlgmr.msra.gmra.mrb[22].mxu0 %vm216_vm2, %v1938_v41 }
0x2383   :  { %2653 = vmatpush3.msra.mxu1 %v3164_v56  ;;  %2654 = vmatprep.mubr.msk.f32.mxu1 %vm2919_vm1, %v2920_v16 }
0x2384   :  { %2776 = vmatpush3.bf16.msra.mxu0 %v3203_v20  ;;  %2665 = vmatprep.mubr.msk.f32.mxu0 %vm2919_vm1, %v2920_v16 }
0x2385   :  { %2777 = vmatprep.subr.bf16.mxu0 %v2918_v10 }
0x2388   :  { %2779 = vmatpush3.bf16.msra.mxu0 %v3209_v25 }
0x2455   :  { %v2007_v42 = vpop.f32.mrb[24].mxu1  ;;  %v2079_v43 = vpop.f32.mrb[22].mxu0 }
0x2456   :  { %v2008_v44 = vadd.f32 %v3231_v30, %v2007_v42  ;;  %v2640_v45 = vpop.f32.mrb[25].mxu1  ;;  %v2651_v46 = vpop.f32.mrb[23].mxu0 }
0x2458   :  { %2012 = vst.msk [vmem:[#allocation3 + $0x18] sm:$0xff] %vm1104_vm3, %v2008_v44  ;;  %2655 = vmatmul.mubr.msk.f32.vlgmr.msra.gmra.mrb[26].mxu1 %vm1104_vm3, %v2008_v44 }
0x252b   :  { %v2152_v56 = vpop.f32.mrb[26].mxu1 }
0x252c   :  { %v2153_v47 = vadd.f32 %v2152_v56, %v2079_v43  ;;  %v2656_v20 = vpop.f32.mrb[27].mxu1 }
0x252e   :  { %v2156_v48 = vadd.f32 %v3189_v0, %v2153_v47 }
0x2530   :  { %2886 = vtanh.f32 %v2156_v48  ;;  %v2317_v10 = vmul.f32 -1.442695, %v2156_v48 }
0x2532   :  { %2888 = vpow2.f32 %v2317_v10 }
0x253a   :  { %v2887_v16 = vpop.eup %2886 }
0x253b   :  { %2166 = vrot.lane.b32.xlu0 %v2887_v16, %s2921_s12 }
0x253c   :  { %v2889_v25 = vpop.eup %2888 }
0x253d   :  { %v2160_v49 = vadd.f32 1.0, %v2889_v25 }
0x253f   :  { %2890 = vrcp.f32 %v2160_v49 }
0x2549   :  { %v2891_v50 = vpop.eup %2890 }
0x254a   :  { %v2164_v22 = vmul.f32 %v2891_v50, %v1929_v37 }
0x25ad   :  { %v2167_v51 = vpop.permute.xlu0 %2166 }
0x25ae   :  { %v2169_v21 = vmul.f32 %v2891_v50, %v2167_v51 }
0x25b0   :  { %2171 = vrot.lane.b32.xlu1 %v2169_v21, %s2922_s3 }
0x2622   :  { %v2172_v52 = vpop.permute.xlu1 %2171 }
0x2623   :  { %v2174_v53 = vadd.f32 %v2172_v52, %v2164_v22 }
0x2625   :  { %2892 = vtanh.f32 %v2174_v53 }
0x262f   :  { %v2893_v55 = vpop.eup %2892 }
0x2630   :  { %2177 = vrot.lane.b32.xlu0 %v2893_v55, %s2921_s12 }
0x26a2   :  { %v2178_v0 = vpop.permute.xlu0 %2177 }
0x26a3   :  { %v2180_v19 = vmul.f32 %v2891_v50, %v2178_v0 }
0x26a5   :  { %2182 = vrot.lane.b32.xlu1 %v2180_v19, %s2922_s3 }
0x2717   :  { %v2183_v58 = vpop.permute.xlu1 %2182 }
0x2718   :  { %2666 = vmatmul.mubr.msk.f32.vlgmr.msra.gmra.mrb[24].mxu0 %vm216_vm2, %v2183_v58 }
0x27eb   :  { %v2252_v59 = vpop.f32.mrb[24].mxu0 }
0x27ec   :  { %v2253_v60 = vadd.f32 %v3231_v30, %v2252_v59  ;;  %v2667_v61 = vpop.f32.mrb[25].mxu0 }
0x27ee   :  { %2257 = vst.msk [vmem:[#allocation3 + $0x20] sm:$0xff] %vm1104_vm3, %v2253_v60 }
0x27ef   :  { %2905 = shalt.err (!%p2902_p4)
}
0x27f0   :  { %s2906_s14 = scalar_lea.hbm %s3341_s9, 640 }
0x27f1   :  { %p2907_p5 = scmp.ne.s32.totalorder %s3341_s9, %s2906_s14  ;;  %p2910_p6 = scmp.lt.u32.totalorder %s2906_s14, %s3341_s9 }
0x27f3   :  { %p2912_p7 = pnand %p2910_p6, %p2907_p5 }
0x27f5   :  { %2915 = shalt.err (!%p2912_p7)
}
0x27f6   :  { %s2924_s18 = smov 128   ;;  %s2925_s19 = smov 8  }
0x27f7   :  { %2269 = dma.vmem_to_hbm [thread:$0]  %s2264_s11, 640, %s3341_s9, [#allocation4], %s2924_s18, %s2924_s18, %s2925_s19  }
0x27f8   :  { %2916 = dma.done.wait [#allocation4], 640  }
0x27f9   :  { %2917 = vsyncadd [#allocation4], 4294966656 }
0x27fa   :  { %2273 = vsyncpa [#allocation4], 1 }

</bundles_post_ra>
